<compile_context>
chip_gen: v7x
topology: tpu7x:2x2x1
jax: 0.10.0
libtpu: 0.0.40
codegen_flags: <defaults>
</compile_context>

<pallas_src>
import jax
import jax.numpy as jnp
from jax.experimental import pallas as pl
from jax.experimental.pallas import tpu as pltpu

N = 8      # number of graph nodes
D = 128    # feature width used for every layer (stands in for 1024/512)

# Weight-slab column layout (each block D=128 lanes wide, bf16):
#   [0,       4D)  encoder HAN : gat1.w || gat2.w (2D) | sem.w1 (D) | sem.w2 (D)
#   [4D,      8D)  decoder HAN : same layout
#   [8D,     13D)  heads       : enc2dec_w || map_w1 (2D) | e2d_er_w | map_w2 | map_w3
# Vector-slab row layout, shape (3, 8, D) f32:
#   block 0 / 1 (enc / dec): a_src1, a_src2, a_dst1, a_dst2, gb1, gb2, sem.b1, pad
#   block 2      (heads)   : map_b1, map_b2, map_b3, pads


def _prelu(x, a):
    return jnp.where(x > 0, x, a * x)


# ----------------------------- fused kernel ---------------------------------

def _premodel_kernel(alphas_ref,                     # SMEM (6,) scalar-prefetch
                     x_ref, neg_ref, w_ref, v_ref,   # per-graph x/mask + weight slabs
                     map_out_ref, loss_ref):
    x = x_ref[...]            # (N, D) f32
    neg = neg_ref[...]        # (N, N) additive attention mask (0 / -1e30)

    def gat_branch(xw_b, a_src, a_dst, bias):
        # destination score: VPU broadcast-multiply + lane reduce -> (N, 1)
        s_dst = jnp.sum(xw_b * a_dst, axis=-1, keepdims=True)
        # TODO(synk): s_src kept as a tiny MXU dot_general producing (1, N)
        # directly; a VPU reduce would need an (N,1)->(1,N) sublane->lane
        # relayout that is brittle to lower at N=8 and saves nothing here.
        s_src = jax.lax.dot_general(a_src, xw_b, (((1,), (1,)), ((), ())),
                                    preferred_element_type=jnp.float32)   # (1, N)
        e = s_dst + s_src                                                 # (N, N)
        e = jnp.where(e > 0, e, 0.2 * e) + neg        # LeakyReLU(0.2) + additive mask
        p = jnp.exp(e - jnp.max(e, axis=-1, keepdims=True))               # masked -> 0
        alpha = p * pl.reciprocal(jnp.sum(p, axis=-1, keepdims=True), approx=True)
        return jnp.dot(alpha.astype(jnp.bfloat16), xw_b.astype(jnp.bfloat16),
                       preferred_element_type=jnp.float32) + bias

    def han(h_in, col0, vblk, a_layer, a_han):
        gw  = w_ref[:, col0:col0 + 2 * D]             # (D, 2D) bf16  gat1.w || gat2.w
        sw1 = w_ref[:, col0 + 2 * D:col0 + 3 * D]     # (D, D)  bf16
        sw2 = w_ref[:, col0 + 3 * D:col0 + 4 * D]     # (D, D)  bf16
        vec = v_ref[vblk]                             # (8, D)  f32 row vectors
        # both GAT projections in one bf16 (D, 2D) matmul (fills 256 MXU lanes)
        xw = jnp.dot(h_in.astype(jnp.bfloat16), gw,
                     preferred_element_type=jnp.float32)                  # (N, 2D)
        h1 = _prelu(gat_branch(xw[:, :D], vec[0:1], vec[2:3], vec[4:5]), a_layer)
        h2 = _prelu(gat_branch(xw[:, D:], vec[1:2], vec[3:4], vec[5:6]), a_layer)
        # SemanticAttention on h = h1 + h2 (beta broadcast over channels, see TODO)
        h = h1 + h2
        t = jnp.tanh(jnp.dot(h.astype(jnp.bfloat16), sw1,
                             preferred_element_type=jnp.float32) + vec[6:7])
        w = jnp.dot(t.astype(jnp.bfloat16), sw2, preferred_element_type=jnp.float32)
        wm = jnp.mean(w, axis=0, keepdims=True)                           # (1, D)
        pz = jnp.exp(wm - jnp.max(wm, axis=-1, keepdims=True))
        beta = pz * pl.reciprocal(jnp.sum(pz, axis=-1, keepdims=True), approx=True)
        return _prelu(beta * h1 + (1.0 - beta) * h2, a_han)               # HAN activation

    enc = han(x, 0, 0, alphas_ref[0], alphas_ref[1])
    dec = han(enc, 4 * D, 1, alphas_ref[2], alphas_ref[3])

    # ---- heads: enc2dec (no bias) + mapping MLP layer 1 stacked into one matmul
    hv = v_ref[2]                                     # (8, D): map_b1, map_b2, map_b3
    c = 8 * D
    head_w  = w_ref[:, c:c + 2 * D]                   # enc2dec_w || map_w1
    e2der_w = w_ref[:, c + 2 * D:c + 3 * D]
    map_w2  = w_ref[:, c + 3 * D:c + 4 * D]
    map_w3  = w_ref[:, c + 4 * D:c + 5 * D]

    head = jnp.dot(enc.astype(jnp.bfloat16), head_w,
                   preferred_element_type=jnp.float32)                    # (N, 2D)
    e2d = head[:, :D]
    m = _prelu(head[:, D:] + hv[0:1], alphas_ref[4])  # map L1 + PReLU (Dropout = id, eval)
    e2d_er = jnp.dot(e2d.astype(jnp.bfloat16), e2der_w,
                     preferred_element_type=jnp.float32)
    m = _prelu(jnp.dot(m.astype(jnp.bfloat16), map_w2,
                       preferred_element_type=jnp.float32) + hv[1:2], alphas_ref[5])
    map_out_ref[...] = (jnp.dot(m.astype(jnp.bfloat16), map_w3,
                                preferred_element_type=jnp.float32) + hv[2:3])

    # ---- fused MSE epilogue: one shared lane reduction over a (3N, D) slab
    diffs = jnp.concatenate([dec - x, e2d - x, e2d_er - x], axis=0)       # (3N, D) f32
    rows = jnp.sum(diffs * diffs, axis=-1, keepdims=True)                 # (3N, 1)
    inv = 1.0 / float(N * D)
    l0 = jnp.sum(rows[0:N]) * inv            # attr_loss
    l1 = jnp.sum(rows[N:2 * N]) * inv        # edge_recon_loss
    l2 = jnp.sum(rows[2 * N:3 * N]) * inv    # mp2vec_feat_pred_loss
    lane = jax.lax.broadcasted_iota(jnp.int32, (1, D), 1)
    loss_ref[...] = jnp.where(lane == 0, l0,
                              jnp.where(lane == 1, l1,
                                        jnp.where(lane == 2, l2, 0.0)))


# ----------------------------- wrapper ---------------------------------------

def premodel_forward(params, x, neg_mask):
    """x: (B, N, D) or (N, D); neg_mask: (B, N, N) or (N, N) additive mask."""
    single = (x.ndim == 2)
    if single:
        x = x[None]
        neg_mask = neg_mask[None]
    B = x.shape[0]

    grid_spec = pltpu.PrefetchScalarGridSpec(
        num_scalar_prefetch=1,                         # PReLU alphas in SMEM
        grid=(B,),
        in_specs=[
            pl.BlockSpec((None, N, D), lambda b, a: (b, 0, 0)),   # x (per graph)
            pl.BlockSpec((None, N, N), lambda b, a: (b, 0, 0)),   # additive mask
            pl.BlockSpec((D, 13 * D), lambda b, a: (0, 0)),       # weight slab (resident)
            pl.BlockSpec((3, 8, D), lambda b, a: (0, 0, 0)),      # vector slab (resident)
        ],
        out_specs=[
            pl.BlockSpec((None, N, D), lambda b, a: (b, 0, 0)),   # mapping output
            pl.BlockSpec((None, 1, D), lambda b, a: (b, 0, 0)),   # per-graph loss row
        ],
    )
    map_out, loss_rows = pl.pallas_call(
        _premodel_kernel,
        grid_spec=grid_spec,
        out_shape=(jax.ShapeDtypeStruct((B, N, D), jnp.float32),
                   jax.ShapeDtypeStruct((B, 1, D), jnp.float32)),
        compiler_params=pltpu.CompilerParams(dimension_semantics=("parallel",)),
    )(params['alphas'], x, neg_mask, params['wslab'], params['vslab'])

    losses = loss_rows[:, 0, :3]
    out = {'attr_loss': losses[:, 0],
           'edge_recon_loss': losses[:, 1],
           'mp2vec_feat_pred_loss': losses[:, 2],
           'mp2vec_feat_mapping_output': map_out}
    if single:
        out = {k: v[0] for k, v in out.items()}
    return out


# ----------------------------- model glue ------------------------------------

def build_neg_mask(edge_index, n):
    """Dense additive attention mask: 0 where edge (src->dst) or self-loop, else -1e30.
    Self-loops guarantee every softmax row has at least one unmasked entry."""
    src, dst = edge_index[0], edge_index[1]
    adj = jnp.zeros((n, n), jnp.float32).at[dst, src].set(1.0)
    adj = adj + jnp.eye(n, dtype=jnp.float32)
    return jnp.where(adj > 0, 0.0, -1e30).astype(jnp.float32)


# ----------------------------- init ------------------------------------------

def init_params(key):
    ke_w, ke_v, kd_w, kd_v, kh = jax.random.split(key, 5)
    s = 1.0 / (D ** 0.5)

    def han_wblock(k):
        k0, k1, k2 = jax.random.split(k, 3)
        gw = s * jax.random.normal(k0, (D, 2 * D), jnp.float32)    # gat1.w || gat2.w
        sw1 = s * jax.random.normal(k1, (D, D), jnp.float32)       # semantic proj 1
        sw2 = s * jax.random.normal(k2, (D, D), jnp.float32)       # semantic proj 2 (no bias)
        return jnp.concatenate([gw, sw1, sw2], axis=1)             # (D, 4D)

    def han_vblock(k):
        k0, k1 = jax.random.split(k, 2)
        a_src = 0.1 * jax.random.normal(k0, (2, D), jnp.float32)
        a_dst = 0.1 * jax.random.normal(k1, (2, D), jnp.float32)
        gb = jnp.zeros((2, D), jnp.float32)
        sb1 = jnp.zeros((1, D), jnp.float32)
        pad = jnp.zeros((1, D), jnp.float32)
        return jnp.concatenate([a_src, a_dst, gb, sb1, pad], axis=0)   # (8, D)

    def head_wblock(k):
        k0, k1, k2, k3, k4 = jax.random.split(k, 5)
        enc2dec_w = s * jax.random.normal(k0, (D, D), jnp.float32)     # no bias
        map_w1 = s * jax.random.normal(k1, (D, D), jnp.float32)
        e2d_er_w = s * jax.random.normal(k2, (D, D), jnp.float32)      # no bias
        map_w2 = s * jax.random.normal(k3, (D, D), jnp.float32)
        map_w3 = s * jax.random.normal(k4, (D, D), jnp.float32)
        return jnp.concatenate([enc2dec_w, map_w1, e2d_er_w, map_w2, map_w3], axis=1)

    wslab = jnp.concatenate([han_wblock(ke_w), han_wblock(kd_w), head_wblock(kh)],
                            axis=1).astype(jnp.bfloat16)               # (D, 13D) bf16
    head_v = jnp.zeros((8, D), jnp.float32)        # rows 0..2 = map_b1/b2/b3 (zero init)
    vslab = jnp.stack([han_vblock(ke_v), han_vblock(kd_v), head_v], axis=0)  # (3,8,D) f32
    # PReLU alphas (init 0.25): [enc layer, enc HAN, dec layer, dec HAN, map1, map2]
    alphas = jnp.full((6,), 0.25, jnp.float32)
    return dict(alphas=alphas, wslab=wslab, vslab=vslab)


# ----------------------------- main ------------------------------------------

if __name__ == "__main__":
    key = jax.random.PRNGKey(0)
    kx, kp = jax.random.split(key)
    B = 4
    x = jax.random.normal(kx, (B, N, D), jnp.float32)
    # deterministic edge_index (2, E): directed ring + a few chords
    src = jnp.array([0, 1, 2, 3, 4, 5, 6, 7, 0, 2, 4, 6], dtype=jnp.int32)
    dst = jnp.array([1, 2, 3, 4, 5, 6, 7, 0, 4, 6, 0, 2], dtype=jnp.int32)
    edge_index = jnp.stack([src, dst])

    params = init_params(kp)
    neg = build_neg_mask(edge_index, N)
    neg = jnp.broadcast_to(neg, (B, N, N))     # same topology for every graph in the batch

    fwd = jax.jit(premodel_forward)
    out = jax.block_until_ready(fwd(params, x, neg))

    assert out['mp2vec_feat_mapping_output'].shape == (B, N, D)
    for k in ('attr_loss', 'edge_recon_loss', 'mp2vec_feat_pred_loss'):
        assert out[k].shape == (B,)
        assert bool(jnp.all(jnp.isfinite(out[k])))
    print("KERNEL_OK")
</pallas_src>

<mosaic_0001>
module attributes {stable_mosaic.version = 11 : i64} {
  func.func @_premodel_kernel(%arg0: i32, %arg1: memref<6xf32, #tpu.memory_space<smem>>, %arg2: memref<1x8x128xf32, #tpu.memory_space<vmem>>, %arg3: memref<1x8x8xf32, #tpu.memory_space<vmem>>, %arg4: memref<128x1664xbf16, #tpu.memory_space<vmem>>, %arg5: memref<3x8x128xf32, #tpu.memory_space<vmem>>, %arg6: memref<1x8x128xf32, #tpu.memory_space<vmem>>, %arg7: memref<1x1x128xf32, #tpu.memory_space<vmem>>) attributes {dimension_semantics = [#tpu.dimension_semantics<parallel>], iteration_bounds = array<i64: 4>, scalar_prefetch = 1 : i64, scratch_operands = 0 : i64, tpu.core_type = #tpu.core_type<tc>, window_params = [{transform_indices = @transform_0, window_bounds = array<i64: 1, 8, 128>}, {transform_indices = @transform_1, window_bounds = array<i64: 1, 8, 8>}, {pipeline_mode = #tpu.pipeline_mode<synchronous>, transform_indices = @transform_2, window_bounds = array<i64: 128, 1664>}, {pipeline_mode = #tpu.pipeline_mode<synchronous>, transform_indices = @transform_3, window_bounds = array<i64: 3, 8, 128>}, {transform_indices = @transform_4, window_bounds = array<i64: 1, 8, 128>}, {transform_indices = @transform_5, window_bounds = array<i64: 1, 1, 128>}]} {
    %c0 = arith.constant 0 : index
    %c0_0 = arith.constant 0 : index
    %c0_1 = arith.constant 0 : index
    %0 = vector.load %arg2[%c0, %c0_0, %c0_1] : memref<1x8x128xf32, #tpu.memory_space<vmem>>, vector<1x8x128xf32>
    %1 = vector.shape_cast %0 : vector<1x8x128xf32> to vector<8x128xf32>
    %c0_2 = arith.constant 0 : index
    %c0_3 = arith.constant 0 : index
    %c0_4 = arith.constant 0 : index
    %2 = vector.load %arg3[%c0_2, %c0_3, %c0_4] : memref<1x8x8xf32, #tpu.memory_space<vmem>>, vector<1x8x8xf32>
    %3 = vector.shape_cast %2 : vector<1x8x8xf32> to vector<8x8xf32>
    %c0_5 = arith.constant 0 : index
    %4 = memref.load %arg1[%c0_5] : memref<6xf32, #tpu.memory_space<smem>>
    %c1 = arith.constant 1 : index
    %5 = memref.load %arg1[%c1] : memref<6xf32, #tpu.memory_space<smem>>
    %c0_6 = arith.constant 0 : index
    %c0_7 = arith.constant 0 : index
    %6 = vector.load %arg4[%c0_6, %c0_7] : memref<128x1664xbf16, #tpu.memory_space<vmem>>, vector<128x256xbf16>
    %c0_8 = arith.constant 0 : index
    %c256 = arith.constant 256 : index
    %7 = vector.load %arg4[%c0_8, %c256] : memref<128x1664xbf16, #tpu.memory_space<vmem>>, vector<128x128xbf16>
    %c0_9 = arith.constant 0 : index
    %c384 = arith.constant 384 : index
    %8 = vector.load %arg4[%c0_9, %c384] : memref<128x1664xbf16, #tpu.memory_space<vmem>>, vector<128x128xbf16>
    %c0_10 = arith.constant 0 : index
    %c0_11 = arith.constant 0 : index
    %c0_12 = arith.constant 0 : index
    %9 = vector.load %arg5[%c0_10, %c0_11, %c0_12] : memref<3x8x128xf32, #tpu.memory_space<vmem>>, vector<1x8x128xf32>
    %10 = vector.shape_cast %9 : vector<1x8x128xf32> to vector<8x128xf32>
    %11 = arith.truncf %1 : vector<8x128xf32> to vector<8x128xbf16>
    %cst = arith.constant dense<0.000000e+00> : vector<8x256xf32>
    %12 = tpu.matmul %11, %6, %cst {dimension_numbers = #tpu.dot_dimension_numbers<[1], [0], [0], [1], [0, 0, 1, 1], [], []>} : vector<8x128xbf16>, vector<128x256xbf16>, vector<8x256xf32> -> vector<8x256xf32>
    %13 = vector.extract_strided_slice %12 {offsets = [0, 0], sizes = [8, 128], strides = [1, 1]} : vector<8x256xf32> to vector<8x128xf32>
    %14 = vector.extract_strided_slice %10 {offsets = [0, 0], sizes = [1, 128], strides = [1, 1]} : vector<8x128xf32> to vector<1x128xf32>
    %15 = vector.extract_strided_slice %10 {offsets = [2, 0], sizes = [1, 128], strides = [1, 1]} : vector<8x128xf32> to vector<1x128xf32>
    %16 = vector.extract_strided_slice %10 {offsets = [4, 0], sizes = [1, 128], strides = [1, 1]} : vector<8x128xf32> to vector<1x128xf32>
    %17 = vector.broadcast %15 : vector<1x128xf32> to vector<8x128xf32>
    %18 = arith.mulf %13, %17 : vector<8x128xf32>
    %cst_13 = arith.constant dense<0.000000e+00> : vector<8xf32>
    %19 = vector.multi_reduction <add>, %18, %cst_13 [1] : vector<8x128xf32> to vector<8xf32>
    %20 = vector.shape_cast %19 : vector<8xf32> to vector<8x1xf32>
    %cst_14 = arith.constant dense<0.000000e+00> : vector<1x8xf32>
    %21 = tpu.matmul %14, %13, %cst_14 {dimension_numbers = #tpu.dot_dimension_numbers<[1], [1], [0], [0], [0, 0, 1, 0], [], []>} : vector<1x128xf32>, vector<8x128xf32>, vector<1x8xf32> -> vector<1x8xf32>
    %22 = vector.broadcast %20 : vector<8x1xf32> to vector<8x8xf32>
    %23 = vector.broadcast %21 : vector<1x8xf32> to vector<8x8xf32>
    %24 = arith.addf %22, %23 : vector<8x8xf32>
    %cst_15 = arith.constant 0.000000e+00 : f32
    %25 = vector.broadcast %cst_15 : f32 to vector<8x8xf32>
    %26 = arith.cmpf ogt, %24, %25 : vector<8x8xf32>
    %cst_16 = arith.constant 2.000000e-01 : f32
    %27 = vector.broadcast %cst_16 : f32 to vector<8x8xf32>
    %28 = arith.mulf %27, %24 : vector<8x8xf32>
    %29 = arith.select %26, %24, %28 : vector<8x8xi1>, vector<8x8xf32>
    %30 = arith.addf %29, %3 : vector<8x8xf32>
    %cst_17 = arith.constant dense<0xFF800000> : vector<8xf32>
    %31 = vector.multi_reduction <maximumf>, %30, %cst_17 [1] : vector<8x8xf32> to vector<8xf32>
    %32 = vector.shape_cast %31 : vector<8xf32> to vector<8x1xf32>
    %33 = vector.broadcast %32 : vector<8x1xf32> to vector<8x8xf32>
    %34 = arith.subf %30, %33 : vector<8x8xf32>
    %35 = math.exp %34 : vector<8x8xf32>
    %cst_18 = arith.constant dense<0.000000e+00> : vector<8xf32>
    %36 = vector.multi_reduction <add>, %35, %cst_18 [1] : vector<8x8xf32> to vector<8xf32>
    %37 = vector.shape_cast %36 : vector<8xf32> to vector<8x1xf32>
    %38 = tpu.reciprocal %37 {approx = true} : vector<8x1xf32> -> vector<8x1xf32>
    %39 = vector.broadcast %38 : vector<8x1xf32> to vector<8x8xf32>
    %40 = arith.mulf %35, %39 : vector<8x8xf32>
    %41 = arith.truncf %40 : vector<8x8xf32> to vector<8x8xbf16>
    %42 = arith.truncf %13 : vector<8x128xf32> to vector<8x128xbf16>
    %cst_19 = arith.constant dense<0.000000e+00> : vector<8x128xf32>
    %43 = tpu.matmul %41, %42, %cst_19 {dimension_numbers = #tpu.dot_dimension_numbers<[1], [0], [0], [1], [0, 0, 1, 1], [], []>} : vector<8x8xbf16>, vector<8x128xbf16>, vector<8x128xf32> -> vector<8x128xf32>
    %44 = vector.broadcast %16 : vector<1x128xf32> to vector<8x128xf32>
    %45 = arith.addf %43, %44 : vector<8x128xf32>
    %cst_20 = arith.constant 0.000000e+00 : f32
    %46 = vector.broadcast %cst_20 : f32 to vector<8x128xf32>
    %47 = arith.cmpf ogt, %45, %46 : vector<8x128xf32>
    %48 = vector.broadcast %4 : f32 to vector<8x128xf32>
    %49 = arith.mulf %48, %45 : vector<8x128xf32>
    %50 = arith.select %47, %45, %49 : vector<8x128xi1>, vector<8x128xf32>
    %51 = vector.extract_strided_slice %12 {offsets = [0, 128], sizes = [8, 128], strides = [1, 1]} : vector<8x256xf32> to vector<8x128xf32>
    %52 = vector.extract_strided_slice %10 {offsets = [1, 0], sizes = [1, 128], strides = [1, 1]} : vector<8x128xf32> to vector<1x128xf32>
    %53 = vector.extract_strided_slice %10 {offsets = [3, 0], sizes = [1, 128], strides = [1, 1]} : vector<8x128xf32> to vector<1x128xf32>
    %54 = vector.extract_strided_slice %10 {offsets = [5, 0], sizes = [1, 128], strides = [1, 1]} : vector<8x128xf32> to vector<1x128xf32>
    %55 = vector.broadcast %53 : vector<1x128xf32> to vector<8x128xf32>
    %56 = arith.mulf %51, %55 : vector<8x128xf32>
    %cst_21 = arith.constant dense<0.000000e+00> : vector<8xf32>
    %57 = vector.multi_reduction <add>, %56, %cst_21 [1] : vector<8x128xf32> to vector<8xf32>
    %58 = vector.shape_cast %57 : vector<8xf32> to vector<8x1xf32>
    %cst_22 = arith.constant dense<0.000000e+00> : vector<1x8xf32>
    %59 = tpu.matmul %52, %51, %cst_22 {dimension_numbers = #tpu.dot_dimension_numbers<[1], [1], [0], [0], [0, 0, 1, 0], [], []>} : vector<1x128xf32>, vector<8x128xf32>, vector<1x8xf32> -> vector<1x8xf32>
    %60 = vector.broadcast %58 : vector<8x1xf32> to vector<8x8xf32>
    %61 = vector.broadcast %59 : vector<1x8xf32> to vector<8x8xf32>
    %62 = arith.addf %60, %61 : vector<8x8xf32>
    %cst_23 = arith.constant 0.000000e+00 : f32
    %63 = vector.broadcast %cst_23 : f32 to vector<8x8xf32>
    %64 = arith.cmpf ogt, %62, %63 : vector<8x8xf32>
    %cst_24 = arith.constant 2.000000e-01 : f32
    %65 = vector.broadcast %cst_24 : f32 to vector<8x8xf32>
    %66 = arith.mulf %65, %62 : vector<8x8xf32>
    %67 = arith.select %64, %62, %66 : vector<8x8xi1>, vector<8x8xf32>
    %68 = arith.addf %67, %3 : vector<8x8xf32>
    %cst_25 = arith.constant dense<0xFF800000> : vector<8xf32>
    %69 = vector.multi_reduction <maximumf>, %68, %cst_25 [1] : vector<8x8xf32> to vector<8xf32>
    %70 = vector.shape_cast %69 : vector<8xf32> to vector<8x1xf32>
    %71 = vector.broadcast %70 : vector<8x1xf32> to vector<8x8xf32>
    %72 = arith.subf %68, %71 : vector<8x8xf32>
    %73 = math.exp %72 : vector<8x8xf32>
    %cst_26 = arith.constant dense<0.000000e+00> : vector<8xf32>
    %74 = vector.multi_reduction <add>, %73, %cst_26 [1] : vector<8x8xf32> to vector<8xf32>
    %75 = vector.shape_cast %74 : vector<8xf32> to vector<8x1xf32>
    %76 = tpu.reciprocal %75 {approx = true} : vector<8x1xf32> -> vector<8x1xf32>
    %77 = vector.broadcast %76 : vector<8x1xf32> to vector<8x8xf32>
    %78 = arith.mulf %73, %77 : vector<8x8xf32>
    %79 = arith.truncf %78 : vector<8x8xf32> to vector<8x8xbf16>
    %80 = arith.truncf %51 : vector<8x128xf32> to vector<8x128xbf16>
    %cst_27 = arith.constant dense<0.000000e+00> : vector<8x128xf32>
    %81 = tpu.matmul %79, %80, %cst_27 {dimension_numbers = #tpu.dot_dimension_numbers<[1], [0], [0], [1], [0, 0, 1, 1], [], []>} : vector<8x8xbf16>, vector<8x128xbf16>, vector<8x128xf32> -> vector<8x128xf32>
    %82 = vector.broadcast %54 : vector<1x128xf32> to vector<8x128xf32>
    %83 = arith.addf %81, %82 : vector<8x128xf32>
    %cst_28 = arith.constant 0.000000e+00 : f32
    %84 = vector.broadcast %cst_28 : f32 to vector<8x128xf32>
    %85 = arith.cmpf ogt, %83, %84 : vector<8x128xf32>
    %86 = vector.broadcast %4 : f32 to vector<8x128xf32>
    %87 = arith.mulf %86, %83 : vector<8x128xf32>
    %88 = arith.select %85, %83, %87 : vector<8x128xi1>, vector<8x128xf32>
    %89 = arith.addf %50, %88 : vector<8x128xf32>
    %90 = arith.truncf %89 : vector<8x128xf32> to vector<8x128xbf16>
    %cst_29 = arith.constant dense<0.000000e+00> : vector<8x128xf32>
    %91 = tpu.matmul %90, %7, %cst_29 {dimension_numbers = #tpu.dot_dimension_numbers<[1], [0], [0], [1], [0, 0, 1, 1], [], []>} : vector<8x128xbf16>, vector<128x128xbf16>, vector<8x128xf32> -> vector<8x128xf32>
    %92 = vector.extract_strided_slice %10 {offsets = [6, 0], sizes = [1, 128], strides = [1, 1]} : vector<8x128xf32> to vector<1x128xf32>
    %93 = vector.broadcast %92 : vector<1x128xf32> to vector<8x128xf32>
    %94 = arith.addf %91, %93 : vector<8x128xf32>
    %95 = math.tanh %94 : vector<8x128xf32>
    %96 = arith.truncf %95 : vector<8x128xf32> to vector<8x128xbf16>
    %cst_30 = arith.constant dense<0.000000e+00> : vector<8x128xf32>
    %97 = tpu.matmul %96, %8, %cst_30 {dimension_numbers = #tpu.dot_dimension_numbers<[1], [0], [0], [1], [0, 0, 1, 1], [], []>} : vector<8x128xbf16>, vector<128x128xbf16>, vector<8x128xf32> -> vector<8x128xf32>
    %cst_31 = arith.constant dense<0.000000e+00> : vector<128xf32>
    %98 = vector.multi_reduction <add>, %97, %cst_31 [0] : vector<8x128xf32> to vector<128xf32>
    %99 = vector.shape_cast %98 : vector<128xf32> to vector<1x128xf32>
    %cst_32 = arith.constant 8.000000e+00 : f32
    %100 = vector.broadcast %cst_32 : f32 to vector<1x128xf32>
    %101 = arith.divf %99, %100 : vector<1x128xf32>
    %cst_33 = arith.constant dense<0xFF800000> : vector<1xf32>
    %102 = vector.multi_reduction <maximumf>, %101, %cst_33 [1] : vector<1x128xf32> to vector<1xf32>
    %103 = vector.shape_cast %102 : vector<1xf32> to vector<1x1xf32>
    %104 = vector.broadcast %103 : vector<1x1xf32> to vector<1x128xf32>
    %105 = arith.subf %101, %104 : vector<1x128xf32>
    %106 = math.exp %105 : vector<1x128xf32>
    %cst_34 = arith.constant dense<0.000000e+00> : vector<1xf32>
    %107 = vector.multi_reduction <add>, %106, %cst_34 [1] : vector<1x128xf32> to vector<1xf32>
    %108 = vector.shape_cast %107 : vector<1xf32> to vector<1x1xf32>
    %109 = tpu.reciprocal %108 {approx = true} : vector<1x1xf32> -> vector<1x1xf32>
    %110 = vector.broadcast %109 : vector<1x1xf32> to vector<1x128xf32>
    %111 = arith.mulf %106, %110 : vector<1x128xf32>
    %112 = vector.broadcast %111 : vector<1x128xf32> to vector<8x128xf32>
    %113 = arith.mulf %112, %50 : vector<8x128xf32>
    %cst_35 = arith.constant 1.000000e+00 : f32
    %114 = vector.broadcast %cst_35 : f32 to vector<1x128xf32>
    %115 = arith.subf %114, %111 : vector<1x128xf32>
    %116 = vector.broadcast %115 : vector<1x128xf32> to vector<8x128xf32>
    %117 = arith.mulf %116, %88 : vector<8x128xf32>
    %118 = arith.addf %113, %117 : vector<8x128xf32>
    %cst_36 = arith.constant 0.000000e+00 : f32
    %119 = vector.broadcast %cst_36 : f32 to vector<8x128xf32>
    %120 = arith.cmpf ogt, %118, %119 : vector<8x128xf32>
    %121 = vector.broadcast %5 : f32 to vector<8x128xf32>
    %122 = arith.mulf %121, %118 : vector<8x128xf32>
    %123 = arith.select %120, %118, %122 : vector<8x128xi1>, vector<8x128xf32>
    %c2 = arith.constant 2 : index
    %124 = memref.load %arg1[%c2] : memref<6xf32, #tpu.memory_space<smem>>
    %c3 = arith.constant 3 : index
    %125 = memref.load %arg1[%c3] : memref<6xf32, #tpu.memory_space<smem>>
    %c0_37 = arith.constant 0 : index
    %c512 = arith.constant 512 : index
    %126 = vector.load %arg4[%c0_37, %c512] : memref<128x1664xbf16, #tpu.memory_space<vmem>>, vector<128x256xbf16>
    %c0_38 = arith.constant 0 : index
    %c768 = arith.constant 768 : index
    %127 = vector.load %arg4[%c0_38, %c768] : memref<128x1664xbf16, #tpu.memory_space<vmem>>, vector<128x128xbf16>
    %c0_39 = arith.constant 0 : index
    %c896 = arith.constant 896 : index
    %128 = vector.load %arg4[%c0_39, %c896] : memref<128x1664xbf16, #tpu.memory_space<vmem>>, vector<128x128xbf16>
    %c1_40 = arith.constant 1 : index
    %c0_41 = arith.constant 0 : index
    %c0_42 = arith.constant 0 : index
    %129 = vector.load %arg5[%c1_40, %c0_41, %c0_42] : memref<3x8x128xf32, #tpu.memory_space<vmem>>, vector<1x8x128xf32>
    %130 = vector.shape_cast %129 : vector<1x8x128xf32> to vector<8x128xf32>
    %131 = arith.truncf %123 : vector<8x128xf32> to vector<8x128xbf16>
    %cst_43 = arith.constant dense<0.000000e+00> : vector<8x256xf32>
    %132 = tpu.matmul %131, %126, %cst_43 {dimension_numbers = #tpu.dot_dimension_numbers<[1], [0], [0], [1], [0, 0, 1, 1], [], []>} : vector<8x128xbf16>, vector<128x256xbf16>, vector<8x256xf32> -> vector<8x256xf32>
    %133 = vector.extract_strided_slice %132 {offsets = [0, 0], sizes = [8, 128], strides = [1, 1]} : vector<8x256xf32> to vector<8x128xf32>
    %134 = vector.extract_strided_slice %130 {offsets = [0, 0], sizes = [1, 128], strides = [1, 1]} : vector<8x128xf32> to vector<1x128xf32>
    %135 = vector.extract_strided_slice %130 {offsets = [2, 0], sizes = [1, 128], strides = [1, 1]} : vector<8x128xf32> to vector<1x128xf32>
    %136 = vector.extract_strided_slice %130 {offsets = [4, 0], sizes = [1, 128], strides = [1, 1]} : vector<8x128xf32> to vector<1x128xf32>
    %137 = vector.broadcast %135 : vector<1x128xf32> to vector<8x128xf32>
    %138 = arith.mulf %133, %137 : vector<8x128xf32>
    %cst_44 = arith.constant dense<0.000000e+00> : vector<8xf32>
    %139 = vector.multi_reduction <add>, %138, %cst_44 [1] : vector<8x128xf32> to vector<8xf32>
    %140 = vector.shape_cast %139 : vector<8xf32> to vector<8x1xf32>
    %cst_45 = arith.constant dense<0.000000e+00> : vector<1x8xf32>
    %141 = tpu.matmul %134, %133, %cst_45 {dimension_numbers = #tpu.dot_dimension_numbers<[1], [1], [0], [0], [0, 0, 1, 0], [], []>} : vector<1x128xf32>, vector<8x128xf32>, vector<1x8xf32> -> vector<1x8xf32>
    %142 = vector.broadcast %140 : vector<8x1xf32> to vector<8x8xf32>
    %143 = vector.broadcast %141 : vector<1x8xf32> to vector<8x8xf32>
    %144 = arith.addf %142, %143 : vector<8x8xf32>
    %cst_46 = arith.constant 0.000000e+00 : f32
    %145 = vector.broadcast %cst_46 : f32 to vector<8x8xf32>
    %146 = arith.cmpf ogt, %144, %145 : vector<8x8xf32>
    %cst_47 = arith.constant 2.000000e-01 : f32
    %147 = vector.broadcast %cst_47 : f32 to vector<8x8xf32>
    %148 = arith.mulf %147, %144 : vector<8x8xf32>
    %149 = arith.select %146, %144, %148 : vector<8x8xi1>, vector<8x8xf32>
    %150 = arith.addf %149, %3 : vector<8x8xf32>
    %cst_48 = arith.constant dense<0xFF800000> : vector<8xf32>
    %151 = vector.multi_reduction <maximumf>, %150, %cst_48 [1] : vector<8x8xf32> to vector<8xf32>
    %152 = vector.shape_cast %151 : vector<8xf32> to vector<8x1xf32>
    %153 = vector.broadcast %152 : vector<8x1xf32> to vector<8x8xf32>
    %154 = arith.subf %150, %153 : vector<8x8xf32>
    %155 = math.exp %154 : vector<8x8xf32>
    %cst_49 = arith.constant dense<0.000000e+00> : vector<8xf32>
    %156 = vector.multi_reduction <add>, %155, %cst_49 [1] : vector<8x8xf32> to vector<8xf32>
    %157 = vector.shape_cast %156 : vector<8xf32> to vector<8x1xf32>
    %158 = tpu.reciprocal %157 {approx = true} : vector<8x1xf32> -> vector<8x1xf32>
    %159 = vector.broadcast %158 : vector<8x1xf32> to vector<8x8xf32>
    %160 = arith.mulf %155, %159 : vector<8x8xf32>
    %161 = arith.truncf %160 : vector<8x8xf32> to vector<8x8xbf16>
    %162 = arith.truncf %133 : vector<8x128xf32> to vector<8x128xbf16>
    %cst_50 = arith.constant dense<0.000000e+00> : vector<8x128xf32>
    %163 = tpu.matmul %161, %162, %cst_50 {dimension_numbers = #tpu.dot_dimension_numbers<[1], [0], [0], [1], [0, 0, 1, 1], [], []>} : vector<8x8xbf16>, vector<8x128xbf16>, vector<8x128xf32> -> vector<8x128xf32>
    %164 = vector.broadcast %136 : vector<1x128xf32> to vector<8x128xf32>
    %165 = arith.addf %163, %164 : vector<8x128xf32>
    %cst_51 = arith.constant 0.000000e+00 : f32
    %166 = vector.broadcast %cst_51 : f32 to vector<8x128xf32>
    %167 = arith.cmpf ogt, %165, %166 : vector<8x128xf32>
    %168 = vector.broadcast %124 : f32 to vector<8x128xf32>
    %169 = arith.mulf %168, %165 : vector<8x128xf32>
    %170 = arith.select %167, %165, %169 : vector<8x128xi1>, vector<8x128xf32>
    %171 = vector.extract_strided_slice %132 {offsets = [0, 128], sizes = [8, 128], strides = [1, 1]} : vector<8x256xf32> to vector<8x128xf32>
    %172 = vector.extract_strided_slice %130 {offsets = [1, 0], sizes = [1, 128], strides = [1, 1]} : vector<8x128xf32> to vector<1x128xf32>
    %173 = vector.extract_strided_slice %130 {offsets = [3, 0], sizes = [1, 128], strides = [1, 1]} : vector<8x128xf32> to vector<1x128xf32>
    %174 = vector.extract_strided_slice %130 {offsets = [5, 0], sizes = [1, 128], strides = [1, 1]} : vector<8x128xf32> to vector<1x128xf32>
    %175 = vector.broadcast %173 : vector<1x128xf32> to vector<8x128xf32>
    %176 = arith.mulf %171, %175 : vector<8x128xf32>
    %cst_52 = arith.constant dense<0.000000e+00> : vector<8xf32>
    %177 = vector.multi_reduction <add>, %176, %cst_52 [1] : vector<8x128xf32> to vector<8xf32>
    %178 = vector.shape_cast %177 : vector<8xf32> to vector<8x1xf32>
    %cst_53 = arith.constant dense<0.000000e+00> : vector<1x8xf32>
    %179 = tpu.matmul %172, %171, %cst_53 {dimension_numbers = #tpu.dot_dimension_numbers<[1], [1], [0], [0], [0, 0, 1, 0], [], []>} : vector<1x128xf32>, vector<8x128xf32>, vector<1x8xf32> -> vector<1x8xf32>
    %180 = vector.broadcast %178 : vector<8x1xf32> to vector<8x8xf32>
    %181 = vector.broadcast %179 : vector<1x8xf32> to vector<8x8xf32>
    %182 = arith.addf %180, %181 : vector<8x8xf32>
    %cst_54 = arith.constant 0.000000e+00 : f32
    %183 = vector.broadcast %cst_54 : f32 to vector<8x8xf32>
    %184 = arith.cmpf ogt, %182, %183 : vector<8x8xf32>
    %cst_55 = arith.constant 2.000000e-01 : f32
    %185 = vector.broadcast %cst_55 : f32 to vector<8x8xf32>
    %186 = arith.mulf %185, %182 : vector<8x8xf32>
    %187 = arith.select %184, %182, %186 : vector<8x8xi1>, vector<8x8xf32>
    %188 = arith.addf %187, %3 : vector<8x8xf32>
    %cst_56 = arith.constant dense<0xFF800000> : vector<8xf32>
    %189 = vector.multi_reduction <maximumf>, %188, %cst_56 [1] : vector<8x8xf32> to vector<8xf32>
    %190 = vector.shape_cast %189 : vector<8xf32> to vector<8x1xf32>
    %191 = vector.broadcast %190 : vector<8x1xf32> to vector<8x8xf32>
    %192 = arith.subf %188, %191 : vector<8x8xf32>
    %193 = math.exp %192 : vector<8x8xf32>
    %cst_57 = arith.constant dense<0.000000e+00> : vector<8xf32>
    %194 = vector.multi_reduction <add>, %193, %cst_57 [1] : vector<8x8xf32> to vector<8xf32>
    %195 = vector.shape_cast %194 : vector<8xf32> to vector<8x1xf32>
    %196 = tpu.reciprocal %195 {approx = true} : vector<8x1xf32> -> vector<8x1xf32>
    %197 = vector.broadcast %196 : vector<8x1xf32> to vector<8x8xf32>
    %198 = arith.mulf %193, %197 : vector<8x8xf32>
    %199 = arith.truncf %198 : vector<8x8xf32> to vector<8x8xbf16>
    %200 = arith.truncf %171 : vector<8x128xf32> to vector<8x128xbf16>
    %cst_58 = arith.constant dense<0.000000e+00> : vector<8x128xf32>
    %201 = tpu.matmul %199, %200, %cst_58 {dimension_numbers = #tpu.dot_dimension_numbers<[1], [0], [0], [1], [0, 0, 1, 1], [], []>} : vector<8x8xbf16>, vector<8x128xbf16>, vector<8x128xf32> -> vector<8x128xf32>
    %202 = vector.broadcast %174 : vector<1x128xf32> to vector<8x128xf32>
    %203 = arith.addf %201, %202 : vector<8x128xf32>
    %cst_59 = arith.constant 0.000000e+00 : f32
    %204 = vector.broadcast %cst_59 : f32 to vector<8x128xf32>
    %205 = arith.cmpf ogt, %203, %204 : vector<8x128xf32>
    %206 = vector.broadcast %124 : f32 to vector<8x128xf32>
    %207 = arith.mulf %206, %203 : vector<8x128xf32>
    %208 = arith.select %205, %203, %207 : vector<8x128xi1>, vector<8x128xf32>
    %209 = arith.addf %170, %208 : vector<8x128xf32>
    %210 = arith.truncf %209 : vector<8x128xf32> to vector<8x128xbf16>
    %cst_60 = arith.constant dense<0.000000e+00> : vector<8x128xf32>
    %211 = tpu.matmul %210, %127, %cst_60 {dimension_numbers = #tpu.dot_dimension_numbers<[1], [0], [0], [1], [0, 0, 1, 1], [], []>} : vector<8x128xbf16>, vector<128x128xbf16>, vector<8x128xf32> -> vector<8x128xf32>
    %212 = vector.extract_strided_slice %130 {offsets = [6, 0], sizes = [1, 128], strides = [1, 1]} : vector<8x128xf32> to vector<1x128xf32>
    %213 = vector.broadcast %212 : vector<1x128xf32> to vector<8x128xf32>
    %214 = arith.addf %211, %213 : vector<8x128xf32>
    %215 = math.tanh %214 : vector<8x128xf32>
    %216 = arith.truncf %215 : vector<8x128xf32> to vector<8x128xbf16>
    %cst_61 = arith.constant dense<0.000000e+00> : vector<8x128xf32>
    %217 = tpu.matmul %216, %128, %cst_61 {dimension_numbers = #tpu.dot_dimension_numbers<[1], [0], [0], [1], [0, 0, 1, 1], [], []>} : vector<8x128xbf16>, vector<128x128xbf16>, vector<8x128xf32> -> vector<8x128xf32>
    %cst_62 = arith.constant dense<0.000000e+00> : vector<128xf32>
    %218 = vector.multi_reduction <add>, %217, %cst_62 [0] : vector<8x128xf32> to vector<128xf32>
    %219 = vector.shape_cast %218 : vector<128xf32> to vector<1x128xf32>
    %cst_63 = arith.constant 8.000000e+00 : f32
    %220 = vector.broadcast %cst_63 : f32 to vector<1x128xf32>
    %221 = arith.divf %219, %220 : vector<1x128xf32>
    %cst_64 = arith.constant dense<0xFF800000> : vector<1xf32>
    %222 = vector.multi_reduction <maximumf>, %221, %cst_64 [1] : vector<1x128xf32> to vector<1xf32>
    %223 = vector.shape_cast %222 : vector<1xf32> to vector<1x1xf32>
    %224 = vector.broadcast %223 : vector<1x1xf32> to vector<1x128xf32>
    %225 = arith.subf %221, %224 : vector<1x128xf32>
    %226 = math.exp %225 : vector<1x128xf32>
    %cst_65 = arith.constant dense<0.000000e+00> : vector<1xf32>
    %227 = vector.multi_reduction <add>, %226, %cst_65 [1] : vector<1x128xf32> to vector<1xf32>
    %228 = vector.shape_cast %227 : vector<1xf32> to vector<1x1xf32>
    %229 = tpu.reciprocal %228 {approx = true} : vector<1x1xf32> -> vector<1x1xf32>
    %230 = vector.broadcast %229 : vector<1x1xf32> to vector<1x128xf32>
    %231 = arith.mulf %226, %230 : vector<1x128xf32>
    %232 = vector.broadcast %231 : vector<1x128xf32> to vector<8x128xf32>
    %233 = arith.mulf %232, %170 : vector<8x128xf32>
    %cst_66 = arith.constant 1.000000e+00 : f32
    %234 = vector.broadcast %cst_66 : f32 to vector<1x128xf32>
    %235 = arith.subf %234, %231 : vector<1x128xf32>
    %236 = vector.broadcast %235 : vector<1x128xf32> to vector<8x128xf32>
    %237 = arith.mulf %236, %208 : vector<8x128xf32>
    %238 = arith.addf %233, %237 : vector<8x128xf32>
    %cst_67 = arith.constant 0.000000e+00 : f32
    %239 = vector.broadcast %cst_67 : f32 to vector<8x128xf32>
    %240 = arith.cmpf ogt, %238, %239 : vector<8x128xf32>
    %241 = vector.broadcast %125 : f32 to vector<8x128xf32>
    %242 = arith.mulf %241, %238 : vector<8x128xf32>
    %243 = arith.select %240, %238, %242 : vector<8x128xi1>, vector<8x128xf32>
    %c2_68 = arith.constant 2 : index
    %c0_69 = arith.constant 0 : index
    %c0_70 = arith.constant 0 : index
    %244 = vector.load %arg5[%c2_68, %c0_69, %c0_70] : memref<3x8x128xf32, #tpu.memory_space<vmem>>, vector<1x8x128xf32>
    %245 = vector.shape_cast %244 : vector<1x8x128xf32> to vector<8x128xf32>
    %c0_71 = arith.constant 0 : index
    %c1024 = arith.constant 1024 : index
    %246 = vector.load %arg4[%c0_71, %c1024] : memref<128x1664xbf16, #tpu.memory_space<vmem>>, vector<128x256xbf16>
    %c0_72 = arith.constant 0 : index
    %c1280 = arith.constant 1280 : index
    %247 = vector.load %arg4[%c0_72, %c1280] : memref<128x1664xbf16, #tpu.memory_space<vmem>>, vector<128x128xbf16>
    %c0_73 = arith.constant 0 : index
    %c1408 = arith.constant 1408 : index
    %248 = vector.load %arg4[%c0_73, %c1408] : memref<128x1664xbf16, #tpu.memory_space<vmem>>, vector<128x128xbf16>
    %c0_74 = arith.constant 0 : index
    %c1536 = arith.constant 1536 : index
    %249 = vector.load %arg4[%c0_74, %c1536] : memref<128x1664xbf16, #tpu.memory_space<vmem>>, vector<128x128xbf16>
    %250 = arith.truncf %123 : vector<8x128xf32> to vector<8x128xbf16>
    %cst_75 = arith.constant dense<0.000000e+00> : vector<8x256xf32>
    %251 = tpu.matmul %250, %246, %cst_75 {dimension_numbers = #tpu.dot_dimension_numbers<[1], [0], [0], [1], [0, 0, 1, 1], [], []>} : vector<8x128xbf16>, vector<128x256xbf16>, vector<8x256xf32> -> vector<8x256xf32>
    %252 = vector.extract_strided_slice %251 {offsets = [0, 0], sizes = [8, 128], strides = [1, 1]} : vector<8x256xf32> to vector<8x128xf32>
    %253 = vector.extract_strided_slice %251 {offsets = [0, 128], sizes = [8, 128], strides = [1, 1]} : vector<8x256xf32> to vector<8x128xf32>
    %254 = vector.extract_strided_slice %245 {offsets = [0, 0], sizes = [1, 128], strides = [1, 1]} : vector<8x128xf32> to vector<1x128xf32>
    %255 = vector.broadcast %254 : vector<1x128xf32> to vector<8x128xf32>
    %256 = arith.addf %253, %255 : vector<8x128xf32>
    %c4 = arith.constant 4 : index
    %257 = memref.load %arg1[%c4] : memref<6xf32, #tpu.memory_space<smem>>
    %cst_76 = arith.constant 0.000000e+00 : f32
    %258 = vector.broadcast %cst_76 : f32 to vector<8x128xf32>
    %259 = arith.cmpf ogt, %256, %258 : vector<8x128xf32>
    %260 = vector.broadcast %257 : f32 to vector<8x128xf32>
    %261 = arith.mulf %260, %256 : vector<8x128xf32>
    %262 = arith.select %259, %256, %261 : vector<8x128xi1>, vector<8x128xf32>
    %263 = arith.truncf %252 : vector<8x128xf32> to vector<8x128xbf16>
    %cst_77 = arith.constant dense<0.000000e+00> : vector<8x128xf32>
    %264 = tpu.matmul %263, %247, %cst_77 {dimension_numbers = #tpu.dot_dimension_numbers<[1], [0], [0], [1], [0, 0, 1, 1], [], []>} : vector<8x128xbf16>, vector<128x128xbf16>, vector<8x128xf32> -> vector<8x128xf32>
    %265 = arith.truncf %262 : vector<8x128xf32> to vector<8x128xbf16>
    %cst_78 = arith.constant dense<0.000000e+00> : vector<8x128xf32>
    %266 = tpu.matmul %265, %248, %cst_78 {dimension_numbers = #tpu.dot_dimension_numbers<[1], [0], [0], [1], [0, 0, 1, 1], [], []>} : vector<8x128xbf16>, vector<128x128xbf16>, vector<8x128xf32> -> vector<8x128xf32>
    %267 = vector.extract_strided_slice %245 {offsets = [1, 0], sizes = [1, 128], strides = [1, 1]} : vector<8x128xf32> to vector<1x128xf32>
    %268 = vector.broadcast %267 : vector<1x128xf32> to vector<8x128xf32>
    %269 = arith.addf %266, %268 : vector<8x128xf32>
    %c5 = arith.constant 5 : index
    %270 = memref.load %arg1[%c5] : memref<6xf32, #tpu.memory_space<smem>>
    %cst_79 = arith.constant 0.000000e+00 : f32
    %271 = vector.broadcast %cst_79 : f32 to vector<8x128xf32>
    %272 = arith.cmpf ogt, %269, %271 : vector<8x128xf32>
    %273 = vector.broadcast %270 : f32 to vector<8x128xf32>
    %274 = arith.mulf %273, %269 : vector<8x128xf32>
    %275 = arith.select %272, %269, %274 : vector<8x128xi1>, vector<8x128xf32>
    %276 = arith.truncf %275 : vector<8x128xf32> to vector<8x128xbf16>
    %cst_80 = arith.constant dense<0.000000e+00> : vector<8x128xf32>
    %277 = tpu.matmul %276, %249, %cst_80 {dimension_numbers = #tpu.dot_dimension_numbers<[1], [0], [0], [1], [0, 0, 1, 1], [], []>} : vector<8x128xbf16>, vector<128x128xbf16>, vector<8x128xf32> -> vector<8x128xf32>
    %278 = vector.extract_strided_slice %245 {offsets = [2, 0], sizes = [1, 128], strides = [1, 1]} : vector<8x128xf32> to vector<1x128xf32>
    %279 = vector.broadcast %278 : vector<1x128xf32> to vector<8x128xf32>
    %280 = arith.addf %277, %279 : vector<8x128xf32>
    %c0_81 = arith.constant 0 : index
    %c0_82 = arith.constant 0 : index
    %c0_83 = arith.constant 0 : index
    %281 = vector.load %arg6[%c0_81, %c0_82, %c0_83] : memref<1x8x128xf32, #tpu.memory_space<vmem>>, vector<1x8x128xf32>
    %282 = vector.shape_cast %281 : vector<1x8x128xf32> to vector<8x128xf32>
    %283 = vector.shape_cast %280 : vector<8x128xf32> to vector<1x8x128xf32>
    tpu.vector_store %arg6[%c0_81, %c0_82, %c0_83], %283 {strides = array<i32>} : memref<1x8x128xf32, #tpu.memory_space<vmem>>, vector<1x8x128xf32>,
    %284 = arith.subf %243, %1 : vector<8x128xf32>
    %285 = arith.subf %252, %1 : vector<8x128xf32>
    %286 = arith.subf %264, %1 : vector<8x128xf32>
    %287 = tpu.concatenate %284, %285, %286 in 0 : vector<8x128xf32>, vector<8x128xf32>, vector<8x128xf32> -> vector<24x128xf32>
    %288 = arith.mulf %287, %287 : vector<24x128xf32>
    %cst_84 = arith.constant dense<0.000000e+00> : vector<24xf32>
    %289 = vector.multi_reduction <add>, %288, %cst_84 [1] : vector<24x128xf32> to vector<24xf32>
    %290 = vector.shape_cast %289 : vector<24xf32> to vector<24x1xf32>
    %291 = vector.extract_strided_slice %290 {offsets = [0, 0], sizes = [8, 1], strides = [1, 1]} : vector<24x1xf32> to vector<8x1xf32>
    %292 = vector.shape_cast %291 : vector<8x1xf32> to vector<1x8x1xf32>
    %cst_85 = arith.constant dense<0.000000e+00> : vector<1xf32>
    %293 = vector.multi_reduction <add>, %292, %cst_85 [1, 2] : vector<1x8x1xf32> to vector<1xf32>
    %294 = vector.shape_cast %293 : vector<1xf32> to vector<1x1x1xf32>
    %295 = vector.extract %294[0, 0, 0] : f32 from vector<1x1x1xf32>
    %cst_86 = arith.constant 9.765625E-4 : f32
    %296 = arith.mulf %295, %cst_86 : f32
    %297 = vector.extract_strided_slice %290 {offsets = [8, 0], sizes = [8, 1], strides = [1, 1]} : vector<24x1xf32> to vector<8x1xf32>
    %298 = vector.shape_cast %297 : vector<8x1xf32> to vector<1x8x1xf32>
    %cst_87 = arith.constant dense<0.000000e+00> : vector<1xf32>
    %299 = vector.multi_reduction <add>, %298, %cst_87 [1, 2] : vector<1x8x1xf32> to vector<1xf32>
    %300 = vector.shape_cast %299 : vector<1xf32> to vector<1x1x1xf32>
    %301 = vector.extract %300[0, 0, 0] : f32 from vector<1x1x1xf32>
    %cst_88 = arith.constant 9.765625E-4 : f32
    %302 = arith.mulf %301, %cst_88 : f32
    %303 = vector.extract_strided_slice %290 {offsets = [16, 0], sizes = [8, 1], strides = [1, 1]} : vector<24x1xf32> to vector<8x1xf32>
    %304 = vector.shape_cast %303 : vector<8x1xf32> to vector<1x8x1xf32>
    %cst_89 = arith.constant dense<0.000000e+00> : vector<1xf32>
    %305 = vector.multi_reduction <add>, %304, %cst_89 [1, 2] : vector<1x8x1xf32> to vector<1xf32>
    %306 = vector.shape_cast %305 : vector<1xf32> to vector<1x1x1xf32>
    %307 = vector.extract %306[0, 0, 0] : f32 from vector<1x1x1xf32>
    %cst_90 = arith.constant 9.765625E-4 : f32
    %308 = arith.mulf %307, %cst_90 : f32
    %309 = tpu.iota {dimensions = array<i32: 1>} : vector<1x128xi32>
    %c0_i32 = arith.constant 0 : i32
    %310 = vector.broadcast %c0_i32 : i32 to vector<1x128xi32>
    %311 = arith.cmpi eq, %309, %310 : vector<1x128xi32>
    %c1_i32 = arith.constant 1 : i32
    %312 = vector.broadcast %c1_i32 : i32 to vector<1x128xi32>
    %313 = arith.cmpi eq, %309, %312 : vector<1x128xi32>
    %c2_i32 = arith.constant 2 : i32
    %314 = vector.broadcast %c2_i32 : i32 to vector<1x128xi32>
    %315 = arith.cmpi eq, %309, %314 : vector<1x128xi32>
    %cst_91 = arith.constant 0.000000e+00 : f32
    %316 = vector.broadcast %308 : f32 to vector<1x128xf32>
    %317 = vector.broadcast %cst_91 : f32 to vector<1x128xf32>
    %318 = arith.select %315, %316, %317 : vector<1x128xi1>, vector<1x128xf32>
    %319 = vector.broadcast %302 : f32 to vector<1x128xf32>
    %320 = arith.select %313, %319, %318 : vector<1x128xi1>, vector<1x128xf32>
    %321 = vector.broadcast %296 : f32 to vector<1x128xf32>
    %322 = arith.select %311, %321, %320 : vector<1x128xi1>, vector<1x128xf32>
    %c0_92 = arith.constant 0 : index
    %c0_93 = arith.constant 0 : index
    %c0_94 = arith.constant 0 : index
    %323 = vector.load %arg7[%c0_92, %c0_93, %c0_94] : memref<1x1x128xf32, #tpu.memory_space<vmem>>, vector<1x1x128xf32>
    %324 = vector.shape_cast %323 : vector<1x1x128xf32> to vector<1x128xf32>
    %325 = vector.shape_cast %322 : vector<1x128xf32> to vector<1x1x128xf32>
    tpu.vector_store %arg7[%c0_92, %c0_93, %c0_94], %325 {strides = array<i32>} : memref<1x1x128xf32, #tpu.memory_space<vmem>>, vector<1x1x128xf32>,
    return
  }
  func.func @transform_0(%arg0: i32, %arg1: memref<6xf32, #tpu.memory_space<smem>>) -> (i32, i32, i32) {
    %c0_i32 = arith.constant 0 : i32
    %c0_i32_0 = arith.constant 0 : i32
    %c0_i32_1 = arith.constant 0 : i32
    return %arg0, %c0_i32, %c0_i32_0 : i32, i32, i32
  }
  func.func @transform_1(%arg0: i32, %arg1: memref<6xf32, #tpu.memory_space<smem>>) -> (i32, i32, i32) {
    %c0_i32 = arith.constant 0 : i32
    %c0_i32_0 = arith.constant 0 : i32
    %c0_i32_1 = arith.constant 0 : i32
    return %arg0, %c0_i32, %c0_i32_0 : i32, i32, i32
  }
  func.func @transform_2(%arg0: i32, %arg1: memref<6xf32, #tpu.memory_space<smem>>) -> (i32, i32) {
    %c0_i32 = arith.constant 0 : i32
    %c0_i32_0 = arith.constant 0 : i32
    %c0_i32_1 = arith.constant 0 : i32
    return %c0_i32, %c0_i32_0 : i32, i32
  }
  func.func @transform_3(%arg0: i32, %arg1: memref<6xf32, #tpu.memory_space<smem>>) -> (i32, i32, i32) {
    %c0_i32 = arith.constant 0 : i32
    %c0_i32_0 = arith.constant 0 : i32
    %c0_i32_1 = arith.constant 0 : i32
    %c0_i32_2 = arith.constant 0 : i32
    return %c0_i32, %c0_i32_0, %c0_i32_1 : i32, i32, i32
  }
  func.func @transform_4(%arg0: i32, %arg1: memref<6xf32, #tpu.memory_space<smem>>) -> (i32, i32, i32) {
    %c0_i32 = arith.constant 0 : i32
    %c0_i32_0 = arith.constant 0 : i32
    %c0_i32_1 = arith.constant 0 : i32
    return %arg0, %c0_i32, %c0_i32_0 : i32, i32, i32
  }
  func.func @transform_5(%arg0: i32, %arg1: memref<6xf32, #tpu.memory_space<smem>>) -> (i32, i32, i32) {
    %c0_i32 = arith.constant 0 : i32
    %c0_i32_0 = arith.constant 0 : i32
    %c0_i32_1 = arith.constant 0 : i32
    return %arg0, %c0_i32, %c0_i32_0 : i32, i32, i32
  }
}

</mosaic_0001>

<bundles_post_ra>
// kernel: premodel_forward.1
= control target key start
LH: loop header
LB: loop body
LE: loop exit
PB: predicated region body
PF: predicated region fallthrough
CT: control target
= control target key end

     0   :  { %s3784_s0 = inlined_call_operand.hbm [shape: f32[6], index: 0, kind: input, shape index: {}]   ;;  %s3785_s1 = inlined_call_operand.hbm [shape: f32[4,8,128], index: 1, kind: input, shape index: {}]   ;;  %s3786_s2 = inlined_call_operand.hbm [shape: f32[4,8,8], index: 2, kind: input, shape index: {}]   ;;  %s3787_s3 = inlined_call_operand.hbm [shape: bf16[128,1664], index: 3, kind: input, shape index: {}]   ;;  %s3788_s4 = inlined_call_operand.hbm [shape: f32[3,8,128], index: 4, kind: input, shape index: {}]   ;;  %s3789_s5 = inlined_call_operand.hbm [shape: f32[4,8,128], index: 5, kind: output, shape index: {0}]   ;;  %s3790_s6 = inlined_call_operand.vmem [shape: f32[4,1,128], index: 6, kind: output, shape index: {1}]  }
   0x1   :  { %3795 = sst [smem:[#allocation19_spill]] %s3787_s3  ;;  %s3030_s23 = scalar_lea.hbm %s3784_s0, 16 }
   0x2   :  { %3796 = sst [smem:[#allocation20_spill]] %s3788_s4  ;;  %p3031_p0 = scmp.ne.s32.totalorder %s3784_s0, %s3030_s23 }
   0x3   :  { %p3034_p1 = scmp.lt.u32.totalorder %s3030_s23, %s3784_s0 }
   0x5   :  { %p3036_p2 = pnand %p3034_p1, %p3031_p0 }
   0x7   :  { %3039 = shalt.err (!%p3036_p2)  }
   0x8   :  { %s3238_s28 = smov [#allocation3]  }
   0x9   :  { %13 = dma.hbm_to_smem %s3784_s0, 16, %s3238_s28, [#allocation2] }
   0xa   :  { %3200 = dma.done.wait [#allocation2], 16 }
   0xb   :  { %3201 = vsyncadd [#allocation2], 4294967280 }
   0xc   :  { %15 = sfence }
   0xd   :  { %16 = vsyncpa [#allocation5], 0 }
   0xe   :  { %18 = vsyncpa [#allocation5 + $0x1], 0 }
   0xf   :  { %19 = vsyncpa [#allocation8], 0 }
  0x10   :  { %21 = vsyncpa [#allocation8 + $0x1], 0 }
  0x11   :  { %22 = vsyncpa [#allocation11], 0 }
  0x12   :  { %23 = vsyncpa [#allocation6], 0 }
  0x13   :  { %25 = vsyncpa [#allocation6 + $0x1], 0  ;;  %s3298_s7 = smov 0   ;;  %s3300_s8 = smov 0  }
  0x14   :  { %s3302_s9 = smov 0   ;;  %s3304_s10 = smov 0  }
  0x15 LB: > { %s3319_s0 = sadd.s32 4294967295, %s3236_s10   ;;  %s2392_s11 = sadd.s32 4294967294, %s3236_s10   ;;  %s3236_s10 = sphi %s3304_s10, %s3817_s10   ;;  %s3232_s9 = sphi %s3302_s9, %s3816_s9   ;;  %s3228_s8 = sphi %s3300_s8, %s3815_s8   ;;  %s3224_s7 = sphi %s3298_s7, %s3814_s7  }
  0x16   : > { %p51_p3 = scmp.ne.s32.totalorder %s3228_s8, %s3224_s7  ;;  %p3791_p4 = scmp.eq.s32.totalorder %s3319_s0, 0 }
  0x17   : > { %p149_p6 = scmp.eq.s32.totalorder %s2392_s11, 3  ;;  %p2393_p8 = scmp.ge.s32.totalorder %s3236_s10, 1 }
  0x18   : > { %p3328_p7 = por %p3791_p4, %p51_p3  ;;  %p182_p10 = scmp.lt.s32.totalorder %s3236_s10, 5 }
  0x19   : > { %p3333_p9 = por %p149_p6, %p51_p3  ;;  %s3239_s15 = smov [#allocation9]  }
  0x1a   : > { %s3797_s12 = scalar_select %p3328_p7, 1, 0 }
  0x1b   : > { %s3798_s13 = scalar_select %p3333_p9, 1, 0 }
  0x1c   : > { %p3338_p11 = pnand %p2393_p8, %p182_p10  ;;  %s194_s16 = sshll.u32 %s3239_s15, 4  ;;  %s195_s16 = int_to_ptr.vmem [resolvable:$true] %s194_s16 }
  0x1d   : > { %s3240_s18 = smov [#allocation10]   ;;  %s3801_s3 = sld [smem:[#allocation19_spill]] }
  0x1e   : > { %s3799_s14 = scalar_select %p3338_p11, 1, 0 }
  0x1f   : > { %p2807_p12 = pneg %p3338_p11  ;;  %s207_s19 = sshll.u32 %s3240_s18, 4  ;;  %s3350_s19 = int_to_ptr.vmem [resolvable:$true] %s207_s19 }
  0x21   : > { %p3346_p13 = pnand %p2807_p12, %p3791_p4 }
  0x23   : > { %s3040_s22 = scalar_lea.hbm %s3801_s3, 13312  ;;  %p3042_p1 = pneg %p3346_p13 }
  0x24   : > { %p3041_p0 = scmp.ne.s32.totalorder %s3801_s3, %s3040_s22  ;;  %p3047_p6 = scmp.lt.u32.totalorder %s3040_s22, %s3801_s3 }
  0x26   : > { %p3043_p2 = pnand %p3042_p1, %p3041_p0 }
  0x28   : > { %p3044_p3 = pneg %p3043_p2 }
  0x2a   : > { %p3049_p8 = pnand %p3047_p6, %p3044_p3 }
  0x2c   : > { %3052 = shalt.err (!%p3049_p8)
}
  0x2d   : > { %s3053_s27 = scalar_lea.vmem %s195_s16, 13312  ;;  %p3061_p5 = scmp.lt.s32.totalorder %s195_s16, %s195_s16 }
  0x2e   : > { %p3054_p10 = scmp.ne.s32.totalorder %s195_s16, %s3053_s27  ;;  %p3062_p9 = scmp.lt.s32.totalorder %s3053_s27, %s3053_s27 }
  0x30   : > { %p3056_p12 = pnand %p3054_p10, %p3042_p1  ;;  %p3063_p7 = por %p3062_p9, %p3061_p5 }
  0x32   : > { %p3057_p4 = pneg %p3056_p12 }
  0x34   : > { %p3064_p11 = pnand %p3063_p7, %p3057_p4 }
  0x36   : > { %3067 = shalt.err (!%p3064_p11)
}
  0x37   : > { %s3241_s28 = smov 832   ;;  %s3242_s29 = smov 52  }
  0x38   : > { %2810 = dma.hbm_to_vmem [thread:$0]  (!%p3346_p13), %s3801_s3, 13312, %s195_s16, [#allocation8], %s3241_s28, %s3241_s28, %s3242_s29  }
  0x39   : > { %s3802_s4 = sld [smem:[#allocation20_spill]] }
  0x3f   : > { %s3068_s20 = scalar_lea.hbm %s3802_s4, 384 }
  0x40   : > { %p3069_p0 = scmp.ne.s32.totalorder %s3802_s4, %s3068_s20  ;;  %p3075_p7 = scmp.lt.u32.totalorder %s3068_s20, %s3802_s4 }
  0x42   : > { %p3071_p4 = pnand %p3069_p0, %p3042_p1 }
  0x44   : > { %p3072_p5 = pneg %p3071_p4 }
  0x46   : > { %p3077_p9 = pnand %p3075_p7, %p3072_p5 }
  0x48   : > { %3080 = shalt.err (!%p3077_p9)
}
  0x49   : > { %s3081_s16 = scalar_lea.vmem %s3350_s19, 384  ;;  %p3089_p6 = scmp.lt.s32.totalorder %s3350_s19, %s3350_s19 }
  0x4a   : > { %p3082_p11 = scmp.ne.s32.totalorder %s3350_s19, %s3081_s16  ;;  %p3090_p8 = scmp.lt.s32.totalorder %s3081_s16, %s3081_s16 }
  0x4c   : > { %p3084_p2 = pnand %p3082_p11, %p3042_p1  ;;  %p3091_p10 = por %p3090_p8, %p3089_p6 }
  0x4e   : > { %p3085_p3 = pneg %p3084_p2 }
  0x50   : > { %p3092_p12 = pnand %p3091_p10, %p3085_p3 }
  0x52   : > { %3095 = shalt.err (!%p3092_p12)
}
  0x53   : > { %s3243_s25 = smov 128   ;;  %s3244_s26 = smov 8  }
  0x54   : > { %2813 = dma.hbm_to_vmem [thread:$0]  (!%p3346_p13), %s3802_s4, 384, %s3350_s19, [#allocation11], %s3243_s25, %s3243_s25, %s3244_s26  }
  0x55   : > { %s3400_s29 = sadd.s32 1, %s3236_s10   ;;  %s38_s11 = sadd.s32 1, %s3232_s9 }
  0x56   : > { %s35_s30 = ssub.s32 %s3236_s10, %s3400_s29  ;;  %p45_p0 = scmp.ne.s32.totalorder %s3232_s9, %s3228_s8 }
  0x57   : > { %p36_p1 = scmp.eq.s32.totalorder %s35_s30, 0  ;;  %p46_p4 = scmp.eq.s32.totalorder %s3236_s10, 0 }
  0x58   : > { %p3803_p7 = scmp.eq.s32.totalorder %s3319_s0, 3  ;;  %p2827_p11 = scmp.lt.s32.totalorder %s3236_s10, 4 }
  0x59   : > { %s3409_s15 = scalar_select %p36_p1, %s3232_s9, %s38_s11  }
  0x5a   : > { %p47_p5 = por %p46_p4, %p45_p0  ;;  %p3413_p9 = por %p3803_p7, %p45_p0 }
  0x5b   : > { %s221_s17 = sand.u32 1, %s3232_s9   ;;  %s2398_s20 = sshll.u32 %s3236_s10, 7 }
  0x5c   : > { %s3804_s18 = scalar_select %p3413_p9, 1, 0 }
  0x5d   : > { %s3419_s19 = sshll.u32 %s221_s17, 3  ;;  %s3425_s23 = scalar_lea.hbm %s3785_s1, %s2398_s20 }
  0x5e   : > { %s225_s24 = scalar_lea.vmem [#allocation4], %s3419_s19  ;;  %p3430_p13 = pnand %p2827_p11, %p47_p5 }
  0x5f   : > { %s232_s16 = sshll.u32 %s225_s24, 4  ;;  %s3437_s28 = scalar_lea.hbm %s3786_s2, %s2398_s20  ;;  %s3428_s16 = int_to_ptr.vmem [resolvable:$true] %s232_s16 }
  0x60   : > { %s239_s30 = sand.u32 1, %s3236_s10   ;;  %s222_s11 = scalar_lea.sflag [#allocation5], %s221_s17 }
  0x61   : > { %s3096_s21 = scalar_lea.hbm %s3425_s23, 128  ;;  %p3098_p3 = pneg %p3430_p13 }
  0x62   : > { %p3097_p2 = scmp.ne.s32.totalorder %s3425_s23, %s3096_s21  ;;  %s3101_s3 = scalar_lea.hbm %s3785_s1, 512 }
  0x63   : > { %p3102_p10 = scmp.lt.u32.totalorder %s3425_s23, %s3785_s1  ;;  %p3103_p12 = scmp.lt.u32.totalorder %s3101_s3, %s3096_s21 }
  0x64   : > { %p3099_p6 = pnand %p3098_p3, %p3097_p2  ;;  %p3105_p0 = scmp.lt.u32.totalorder %s3096_s21, %s3425_s23 }
  0x65   : > { %p3104_p1 = por %p3103_p12, %p3102_p10 }
  0x66   : > { %p3100_p8 = pneg %p3099_p6 }
  0x67   : > { %p3106_p4 = por %p3105_p0, %p3104_p1 }
  0x69   : > { %p3107_p5 = pnand %p3106_p4, %p3100_p8 }
  0x6b   : > { %3110 = shalt.err (!%p3107_p5)
}
  0x6c   : > { %s3111_s17 = scalar_lea.vmem %s3428_s16, 128  ;;  %s3245_s20 = smov [#allocation4]  }
  0x6d   : > { %p3112_p7 = scmp.ne.s32.totalorder %s3428_s16, %s3111_s17  ;;  %s3116_s27 = sshll.u32 %s3245_s20, 4  ;;  %s3117_s27 = int_to_ptr.vmem [resolvable:$false] %s3116_s27 }
  0x6e   : > { %s3118_s4 = scalar_lea.vmem %s3117_s27, 256  ;;  %p3119_p6 = scmp.lt.s32.totalorder %s3428_s16, %s3117_s27 }
  0x6f   : > { %p3114_p11 = pnand %p3112_p7, %p3098_p3  ;;  %p3120_p10 = scmp.lt.s32.totalorder %s3118_s4, %s3111_s17 }
  0x71   : > { %p3115_p2 = pneg %p3114_p11  ;;  %p3121_p12 = por %p3120_p10, %p3119_p6 }
  0x73   : > { %p3122_p1 = pnand %p3121_p12, %p3115_p2 }
  0x75   : > { %3125 = shalt.err (!%p3122_p1)
}
  0x76   : > { %2817 = dma.hbm_to_vmem [thread:$0]  (!%p3430_p13), %s3425_s23, 128, %s3428_s16, %s222_s11  }
  0x77   : > { %s243_s3 = scalar_lea.vmem [#allocation7], %s3419_s19  ;;  %s240_s22 = scalar_lea.sflag [#allocation8], %s239_s30 }
  0x78   : > { %s250_s21 = sshll.u32 %s243_s3, 4  ;;  %s3126_s24 = scalar_lea.hbm %s3437_s28, 128  ;;  %s251_s21 = int_to_ptr.vmem [resolvable:$true] %s250_s21 }
  0x79   : > { %p3127_p8 = scmp.ne.s32.totalorder %s3437_s28, %s3126_s24  ;;  %s3131_s20 = scalar_lea.hbm %s3786_s2, 512 }
  0x7a   : > { %p3132_p5 = scmp.lt.u32.totalorder %s3437_s28, %s3786_s2  ;;  %p3133_p7 = scmp.lt.u32.totalorder %s3131_s20, %s3126_s24 }
  0x7b   : > { %p3129_p0 = pnand %p3127_p8, %p3098_p3  ;;  %p3135_p2 = scmp.lt.u32.totalorder %s3126_s24, %s3437_s28 }
  0x7c   : > { %p3134_p11 = por %p3133_p7, %p3132_p5 }
  0x7d   : > { %p3130_p4 = pneg %p3129_p0 }
  0x7e   : > { %p3136_p6 = por %p3135_p2, %p3134_p11 }
  0x80   : > { %p3137_p10 = pnand %p3136_p6, %p3130_p4 }
  0x82   : > { %3140 = shalt.err (!%p3137_p10)
}
  0x83   : > { %s3141_s19 = scalar_lea.vmem %s251_s21, 128  ;;  %s3246_s23 = smov [#allocation7]  }
  0x84   : > { %p3142_p12 = scmp.ne.s32.totalorder %s251_s21, %s3141_s19  ;;  %s3146_s16 = sshll.u32 %s3246_s23, 4  ;;  %s3147_s16 = int_to_ptr.vmem [resolvable:$false] %s3146_s16 }
  0x85   : > { %s3148_s30 = scalar_lea.vmem %s3147_s16, 256  ;;  %p3149_p0 = scmp.lt.s32.totalorder %s251_s21, %s3147_s16 }
  0x86   : > { %p3144_p1 = pnand %p3142_p12, %p3098_p3  ;;  %p3150_p9 = scmp.lt.s32.totalorder %s3148_s30, %s3141_s19 }
  0x88   : > { %p3145_p8 = pneg %p3144_p1  ;;  %p3151_p5 = por %p3150_p9, %p3149_p0 }
  0x8a   : > { %p3152_p7 = pnand %p3151_p5, %p3145_p8 }
  0x8c   : > { %3155 = shalt.err (!%p3152_p7)
}
  0x8d   : > { %2820 = dma.hbm_to_vmem [thread:$0]  (!%p3430_p13), %s3437_s28, 128, %s251_s21, %s240_s22  }
  0x8e   : > { %p3806_p4 = scmp.ne.s32.totalorder %s3799_s14, 0 }
  0x8f   : > { %s3490_s11 = sand.u32 (!%p3806_p4), 1, %s3228_s8   ;;  %p3807_p9 = scmp.ne.s32.totalorder (!%p3806_p4), %s3797_s12, 0 }
  0x90   : > { %259 = sbr.rel (%p3806_p4) target bundleno = 5143 (0x1417), region = 36  ;;  %s3493_s3 = sshll.u32 (!%p3806_p4), %s3490_s11, 3 }
  0x91   : > { %s262_s24 = scalar_lea.sflag (!%p3806_p4), [#allocation5], %s3490_s11  ;;  %s265_s26 = scalar_lea.vmem (!%p3806_p4), [#allocation4], %s3493_s3 }
  0x97   : > { %3203 = dma.done.wait (%p3807_p9), %s262_s24, 128  }
  0x98   : > { %3205 = vsyncadd (%p3807_p9), %s262_s24, 4294967168  ;;  %s270_s14 = sand.u32 1, %s3319_s0   ;;  %s274_s28 = scalar_lea.vmem [#allocation7], %s3493_s3 }
  0x99   : > { %s271_s25 = scalar_lea.sflag [#allocation8], %s270_s14 }
  0x9a   : > { %3207 = dma.done.wait (%p3807_p9), %s271_s25, 128  }
  0x9b   : > { %3209 = vsyncadd (%p3807_p9), %s271_s25, 4294967168  ;;  %p3808_p13 = scmp.eq.s32.totalorder %s3319_s0, 0 }
  0x9d   : > { %3211 = dma.done.wait (%p3808_p13), [#allocation8], 13312   ;;  %p3809_p3 = pmov %p3808_p13 }
  0x9f   : > { %3213 = vsyncadd (%p3809_p3), [#allocation8], 4294953984  ;;  %p3810_p11 = pmov %p3809_p3 }
  0xa0   : > { %p3811_p2 = pmov %p3809_p3 }
  0xa1   : > { %3215 = dma.done.wait (%p3810_p11), [#allocation11], 384  }
  0xa2   : > { %3217 = vsyncadd (%p3811_p2), [#allocation11], 4294966912  ;;  %v3247_v0 = vmov 0   ;;  %v2873_v1 = vld [vmem:[#allocation9 + $0x4] ss:$52 sps:$4 sm:$0xff]   ;;  %v3248_v19 = vmov 0.0   ;;  %v496_v20 = vlaneseq }
  0xa3   : > { %487 = vmatprep.mubr.bf16.mxu0 %v3247_v0  ;;  %v2875_v2 = vld [vmem:[#allocation9] ss:$52 sps:$4 sm:$0xff]   ;;  %455 = vmatprep.subr.bf16.mxu0 %v2873_v1  ;;  %v2878_v4 = vld [vmem:[#allocation9 + $0x68] ss:$52 sps:$4 sm:$0xff]   ;;  %v2881_v6 = vld [vmem:[#allocation9 + $0xd0] ss:$52 sps:$4 sm:$0xff]  }
  0xa4   : > { %v2876_v3 = vld [vmem:[#allocation9 + $0x6c] ss:$52 sps:$4 sm:$0xff]   ;;  %456 = vmatpush1.bf16.msra.mxu0 %v2875_v2  ;;  %v2879_v5 = vld [vmem:[#allocation9 + $0xd4] ss:$52 sps:$4 sm:$0xff]   ;;  %v2882_v7 = vld [vmem:[#allocation9 + $0x13c] ss:$52 sps:$4 sm:$0xff]   ;;  %2603 = vmatprep.subr.mxu1 %v3248_v19 }
  0xa5   : > { %457 = vmatprep.subr.bf16.mxu0 %v2876_v3  ;;  %v2884_v8 = vld [vmem:[#allocation9 + $0x138] ss:$52 sps:$4 sm:$0xff]   ;;  %v2887_v10 = vld [vmem:[#allocation9 + $0x1a0] ss:$52 sps:$4 sm:$0xff]   ;;  %v2890_v12 = vld [vmem:[#allocation9 + $0x208] ss:$52 sps:$4 sm:$0xff]  }
  0xa6   : > { %v2885_v9 = vld [vmem:[#allocation9 + $0x1a4] ss:$52 sps:$4 sm:$0xff]   ;;  %v2888_v11 = vld [vmem:[#allocation9 + $0x20c] ss:$52 sps:$4 sm:$0xff]   ;;  %v2891_v13 = vld [vmem:[#allocation9 + $0x274] ss:$52 sps:$4 sm:$0xff]  }
  0xa7   : > { %v2893_v14 = vld [vmem:[#allocation9 + $0x270] ss:$52 sps:$4 sm:$0xff]   ;;  %v2896_v16 = vld [vmem:[#allocation9 + $0x2d8] ss:$52 sps:$4 sm:$0xff]   ;;  %vm3249_vm0 = vmmov 0   ;;  %v3525_v21 = vshrl.u32 %v496_v20, 7 }
  0xa8   : > { %458 = vmatpush1.bf16.msra.mxu0 %v2878_v4  ;;  %v2894_v15 = vld [vmem:[#allocation9 + $0x2dc] ss:$52 sps:$4 sm:$0xff]   ;;  %v321_v17 = vld [vmem:[%s265_s26] sm:$0xff]  ;;  %2605 = vmatprep.mubr.msk.f32.mxu1 %vm3249_vm0, %v3248_v19  ;;  %vm603_vm1 = vcmask 1043456   ;;  %vm582_vm3 = vcmask 64512   ;;  %s323_s12 = sld [smem:[#allocation3]] }
  0xa9   : > { %459 = vmatprep.subr.bf16.mxu0 %v2879_v5  ;;  %v374_v18 = vpack.c.bf16 %v321_v17, %v321_v17  ;;  %v3528_v22 = vsub.s32 2, %v3525_v21  ;;  %v3530_v23 = vld [vmem:[#allocation10] sm:$0xff]  ;;  %v3541_v32 = vsub.s32 0, %v3525_v21  ;;  %v3546_v39 = vld [vmem:[%s274_s28] sm:$0xff]  ;;  %v653_v46 = vsub.s32 3, %v3525_v21  ;;  %s2407_s21 = sld [smem:[#allocation3 + $0x1]] }
  0xaa   : > { %v659_v56 = vrot.slane %v3530_v23, 1  ;;  %s2442_s22 = sld [smem:[#allocation3 + $0x2]]  ;;  %s2494_s17 = sld [smem:[#allocation3 + $0x4]]  ;;  %vm2195_vm15 = vcmask 7168  }
  0xab   : > { %v499_v24 = vrot.slane %v3530_v23, %v3528_v22  ;;  %v654_v48 = vrot.slane %v3530_v23, %v653_v46  ;;  %s2511_s20 = sld [smem:[#allocation3 + $0x5]]  ;;  %s311_s27 = scalar_lea.vmem [#allocation12], %s3493_s3 }
  0xac   : > { %460 = vmatpush1.bf16.msra.mxu0 %v2881_v6  ;;  %s2443_s4 = sld [smem:[#allocation3 + $0x3]]  ;;  %s2521_s19 = sshll.u32 %s3319_s0, 7 }
  0xad   : > { %461 = vmatprep.subr.bf16.mxu0 %v2882_v7  ;;  %s2258_s23 = sshll.u32 %s311_s27, 4  ;;  %s3741_s24 = scalar_lea.hbm %s3789_s5, %s2521_s19  ;;  %s2259_s23 = int_to_ptr.vmem [resolvable:$true] %s2258_s23 }
  0xae   : > { %s3156_s14 = scalar_lea.vmem %s2259_s23, 128  ;;  %p3812_p10 = scmp.ne.s32.totalorder %s3804_s18, 0 }
  0xaf   : > { %p3157_p6 = scmp.ne.s32.totalorder %s2259_s23, %s3156_s14  ;;  %s3250_s25 = smov [#allocation12]  }
  0xb0   : > { %462 = vmatpush1.bf16.msra.mxu0 %v2884_v8  ;;  %s3160_s28 = sshll.u32 %s3250_s25, 4  ;;  %s3161_s28 = int_to_ptr.vmem [resolvable:$false] %s3160_s28 }
  0xb1   : > { %463 = vmatprep.subr.bf16.mxu0 %v2885_v9  ;;  %p3158_p12 = pnand %p3157_p6, %p3812_p10  ;;  %p3163_p8 = scmp.lt.s32.totalorder %s2259_s23, %s3161_s28 }
  0xb3   : > { %p3159_p1 = pneg %p3158_p12 }
  0xb4   : > { %464 = vmatpush1.bf16.msra.mxu0 %v2887_v10 }
  0xb5   : > { %465 = vmatprep.subr.bf16.mxu0 %v2888_v11 }
  0xb8   : > { %466 = vmatpush1.bf16.msra.mxu0 %v2890_v12 }
  0xb9   : > { %467 = vmatprep.subr.bf16.mxu0 %v2891_v13 }
  0xbc   : > { %468 = vmatpush1.bf16.msra.mxu0 %v2893_v14 }
  0xbd   : > { %469 = vmatprep.subr.bf16.mxu0 %v2894_v15 }
  0xc0   : > { %470 = vmatpush1.bf16.msra.mxu0 %v2896_v16  ;;  %v2897_v16 = vld [vmem:[#allocation9 + $0x8] ss:$52 sps:$4 sm:$0xff]  }
  0xc1   : > { %2645 = vmatprep.subr.bf16.mxu0 %v3248_v19 }
  0xc3   : > { %488 = vmatmul.mubr.bf16.vlgmr.msra.gmra.mrb[0].mxu0 %v374_v18  ;;  %v2898_v18 = vld [vmem:[#allocation9 + $0x70] ss:$52 sps:$4 sm:$0xff]  }
  0xc4   : > { %2661 = vmatprep.mubr.msk.bf16.mxu0 %vm3249_vm0, %v3248_v19 }
 0x196   : > { %v489_v25 = vpop.f32.mrb[0].mxu0 }
 0x197   : > { %v595_v26 = vpack.c.bf16 %v489_v25, %v489_v25  ;;  %v491_v27 = vpop.f32.mrb[1].mxu0  ;;  %2604 = vmatpush3.xpose.msra.mxu1 %v489_v25  ;;  %v500_v28 = vmul.f32 %v499_v24, %v489_v25  ;;  %v2899_v24 = vld [vmem:[#allocation9 + $0xd8] ss:$52 sps:$4 sm:$0xff]   ;;  %v2900_v25 = vld [vmem:[#allocation9 + $0x140] ss:$52 sps:$4 sm:$0xff]  }
 0x198   : > { %v493_v29 = vpop.f32.mrb[2].mxu0  ;;  %2608 = vmatprep.subr.bf16.mxu1 %v3248_v19  ;;  %v655_v50 = vmul.f32 %v654_v48, %v491_v27  ;;  %v752_v55 = vpack.c.bf16 %v491_v27, %v491_v27 }
 0x199   : > { %501 = vadd.xlane.f32.xlu0 %v500_v28  ;;  %v494_v30 = vpop.f32.mrb[3].mxu0  ;;  %v605_v31 = vsel %vm603_vm1, %v595_v26, 0  ;;  %v2901_v26 = vld [vmem:[#allocation9 + $0x1a8] ss:$52 sps:$4 sm:$0xff]   ;;  %v2903_v28 = vld [vmem:[#allocation9 + $0x278] ss:$52 sps:$4 sm:$0xff]  }
 0x19a   : > { %2606 = vmatmul.mubr.f32.vlgmr.msra.gmra.mrb[0].mxu1 %v3530_v23  ;;  %v761_v57 = vsel %vm603_vm1, %v752_v55, 0  ;;  %v2904_v29 = vld [vmem:[#allocation9 + $0x2e0] ss:$52 sps:$4 sm:$0xff]  }
 0x19b   : > { %2609 = vmatpush3.bf16.msra.mxu1 %v605_v31  ;;  %2610 = vmatprep.mubr.msk.bf16.mxu1 %vm3249_vm0, %v3248_v19  ;;  %v2905_v30 = vld [vmem:[#allocation9 + $0xc] ss:$52 sps:$4 sm:$0xff]   ;;  %v2906_v31 = vld [vmem:[#allocation9 + $0x74] ss:$52 sps:$4 sm:$0xff]  }
 0x19c   : > { %2614 = vmatprep.subr.mxu1 %v3248_v19  ;;  %2646 = vmatpush3.bf16.msra.mxu0 %v2905_v30  ;;  %v2910_v55 = vld [vmem:[#allocation9 + $0x214] ss:$52 sps:$4 sm:$0xff]  }
 0x19d   : > { %2647 = vmatprep.subr.bf16.mxu0 %v3248_v19  ;;  %v2922_v30 = vld [vmem:[#allocation9 + $0x148] ss:$52 sps:$4 sm:$0xff]  }
 0x1a0   : > { %2648 = vmatpush3.bf16.msra.mxu0 %v2906_v31  ;;  %v2927_v31 = vld [vmem:[#allocation9 + $0x1b4] ss:$52 sps:$4 sm:$0xff]  }
 0x1a1   : > { %2649 = vmatprep.subr.bf16.mxu0 %v3248_v19 }
 0x226   : > { %v502_v36 = vpop.xlane.xlu0 %501 }
 0x26d   : > { %v569_v33 = vpop.f32.mrb[0].mxu1 }
 0x26e   : > { %v576_v34 = vrot.slane %v569_v33, %v3541_v32  ;;  %v2607_v35 = vpop.f32.mrb[1].mxu1  ;;  %v2907_v33 = vld [vmem:[#allocation9 + $0xdc] ss:$52 sps:$4 sm:$0xff]  }
 0x26f   : > { %2650 = vmatpush3.bf16.msra.mxu0 %v2907_v33  ;;  %v598_v35 = vsub.s32 4, %v3525_v21  ;;  %v2925_v33 = vld [vmem:[#allocation9 + $0x1b0] ss:$52 sps:$4 sm:$0xff]  }
 0x270   : > { %v577_v37 = vadd.f32 %v576_v34, %v502_v36  ;;  %v2908_v34 = vld [vmem:[#allocation9 + $0x144] ss:$52 sps:$4 sm:$0xff]   ;;  %2651 = vmatprep.subr.bf16.mxu0 %v3248_v19 }
 0x271   : > { %v599_v36 = vrot.slane %v3530_v23, %v598_v35 }
 0x272   : > { %v579_v38 = vmul.f32 0.2, %v577_v37  ;;  %vm578_vm2 = vcmp.gt.f32.partialorder %v577_v37, 0.0 }
 0x273   : > { %2652 = vmatpush3.bf16.msra.mxu0 %v2908_v34  ;;  %v2930_v34 = vld [vmem:[#allocation9 + $0x21c] ss:$52 sps:$4 sm:$0xff]  }
 0x274   : > { %v580_v40 = vsel %vm578_vm2, %v577_v37, %v579_v38  ;;  %2653 = vmatprep.subr.bf16.mxu0 %v3248_v19  ;;  %v755_v37 = vsub.s32 5, %v3525_v21 }
 0x275   : > { %v581_v41 = vadd.f32 %v580_v40, %v3546_v39 }
 0x276   : > { %v756_v40 = vrot.slane %v3530_v23, %v755_v37 }
 0x277   : > { %v583_v42 = vsel %vm582_vm3, %v581_v41, -inf }
 0x278   : > { %584 = vmax.xlane.f32.xlu0 %v583_v42 }
 0x305   : > { %v585_v43 = vpop.xlane.xlu0 %584 }
 0x306   : > { %v586_v44 = vsub.f32 %v581_v41, %v585_v43  ;;  %v648_v41 = vstv %s323_s12  ;;  %s3162_s12 = scalar_lea.vmem %s3161_s28, 256 }
 0x307   : > { %p3164_p0 = scmp.lt.s32.totalorder %s3162_s12, %s3156_s14 }
 0x308   : > { %v587_v45 = vmul.f32 1.442695, %v586_v44 }
 0x309   : > { %p3165_p5 = por %p3164_p0, %p3163_p8 }
 0x30a   : > { %3001 = vpow2.f32 %v587_v45 }
 0x30b   : > { %p3166_p7 = pnand %p3165_p5, %p3159_p1 }
 0x314   : > { %v3002_v47 = vpop.eup %3001 }
 0x315   : > { %v589_v49 = vsel %vm582_vm3, %v3002_v47, 0.0 }
 0x316   : > { %590 = vadd.xlane.f32.xlu1 %v589_v49 }
 0x31a   : > { %656 = vadd.xlane.f32.xlu1 %v655_v50 }
 0x3a3   : > { %v591_v51 = vpop.xlane.xlu1 %590 }
 0x3a4   : > { %3003 = vrcp.f32 %v591_v51 }
 0x3a7   : > { %v657_v2 = vpop.xlane.xlu1 %656 }
 0x3ae   : > { %v3004_v52 = vpop.eup %3003 }
 0x3af   : > { %v593_v53 = vmul.f32 %v3004_v52, %v3002_v47 }
 0x3b1   : > { %v594_v54 = vpack.c.bf16 %v593_v53, %v593_v53 }
 0x3b3   : > { %2611 = vmatmul.mubr.msk.bf16.vlgmr.msra.gmra.mrb[4].mxu1 %vm582_vm3, %v594_v54  ;;  %v2909_v54 = vld [vmem:[#allocation9 + $0x1ac] ss:$52 sps:$4 sm:$0xff]  }
 0x3b4   : > { %2615 = vmatpush3.xpose.msra.mxu1 %v491_v27  ;;  %2616 = vmatprep.mubr.msk.f32.mxu1 %vm3249_vm0, %v3248_v19  ;;  %v2902_v27 = vld [vmem:[#allocation9 + $0x210] ss:$52 sps:$4 sm:$0xff]  }
 0x3b5   : > { %2619 = vmatprep.subr.bf16.mxu1 %v3248_v19  ;;  %2654 = vmatpush3.bf16.msra.mxu0 %v2909_v54 }
 0x3b6   : > { %2655 = vmatprep.subr.bf16.mxu0 %v3248_v19 }
 0x3b9   : > { %2656 = vmatpush3.bf16.msra.mxu0 %v2910_v55 }
 0x3ba   : > { %2657 = vmatprep.subr.bf16.mxu0 %v3248_v19 }
 0x3bb   : > { %2617 = vmatmul.mubr.f32.vlgmr.msra.gmra.mrb[2].mxu1 %v659_v56  ;;  %v2911_v56 = vld [vmem:[#allocation9 + $0x27c] ss:$52 sps:$4 sm:$0xff]  }
 0x3bc   : > { %2620 = vmatpush3.bf16.msra.mxu1 %v761_v57  ;;  %2621 = vmatprep.mubr.msk.bf16.mxu1 %vm3249_vm0, %v3248_v19  ;;  %v2912_v57 = vld [vmem:[#allocation9 + $0x2e4] ss:$52 sps:$4 sm:$0xff]  }
 0x3bd   : > { %2625 = vmatprep.subr.bf16.mxu1 %v3248_v19  ;;  %2658 = vmatpush3.bf16.msra.mxu0 %v2911_v56 }
 0x3be   : > { %2659 = vmatprep.subr.bf16.mxu0 %v3248_v19 }
 0x3c1   : > { %2660 = vmatpush3.bf16.msra.mxu0 %v2912_v57  ;;  %v3618_v57 = vld [vmem:[#allocation10 + $0x8] sm:$0xff] }
 0x3c2   : > { %2665 = vmatprep.subr.mxu0 %v3248_v19 }
 0x486   : > { %v3564_v58 = vpop.f32.mrb[4].mxu1 }
 0x487   : > { %v2612_v59 = vpop.f32.mrb[5].mxu1  ;;  %v642_v38 = vadd.f32 %v3564_v58, %v599_v36  ;;  %v810_v58 = vsub.s32 6, %v3525_v21  ;;  %v2928_v36 = vld [vmem:[#allocation9 + $0x218] ss:$52 sps:$4 sm:$0xff]  }
 0x488   : > { %v644_v60 = vpop.f32.mrb[6].mxu1 }
 0x489   : > { %v2613_v61 = vpop.f32.mrb[7].mxu1  ;;  %v649_v43 = vmul.f32 %v648_v41, %v642_v38  ;;  %vm647_vm5 = vcmp.gt.f32.partialorder %v642_v38, 0.0  ;;  %v811_v59 = vrot.slane %v3530_v23, %v810_v58 }
 0x48b   : > { %v3593_v50 = vsel %vm647_vm5, %v642_v38, %v649_v43  ;;  %v2933_v38 = vld [vmem:[#allocation9 + $0x284] ss:$52 sps:$4 sm:$0xff]  }
 0x48e   : > { %v727_v62 = vpop.f32.mrb[2].mxu1 }
 0x48f   : > { %v734_v63 = vrot.slane %v727_v62, %v3541_v32  ;;  %v2618_v1 = vpop.f32.mrb[3].mxu1 }
 0x491   : > { %v735_v3 = vadd.f32 %v734_v63, %v657_v2 }
 0x493   : > { %v737_v4 = vmul.f32 0.2, %v735_v3  ;;  %vm736_vm4 = vcmp.gt.f32.partialorder %v735_v3, 0.0 }
 0x495   : > { %v738_v5 = vsel %vm736_vm4, %v735_v3, %v737_v4 }
 0x496   : > { %v739_v6 = vadd.f32 %v738_v5, %v3546_v39 }
 0x498   : > { %v740_v7 = vsel %vm582_vm3, %v739_v6, -inf }
 0x499   : > { %741 = vmax.xlane.f32.xlu0 %v740_v7 }
 0x526   : > { %v742_v8 = vpop.xlane.xlu0 %741 }
 0x527   : > { %v743_v9 = vsub.f32 %v739_v6, %v742_v8 }
 0x529   : > { %v744_v10 = vmul.f32 1.442695, %v743_v9 }
 0x52b   : > { %3005 = vpow2.f32 %v744_v10 }
 0x535   : > { %v3006_v11 = vpop.eup %3005 }
 0x536   : > { %v746_v12 = vsel %vm582_vm3, %v3006_v11, 0.0 }
 0x537   : > { %747 = vadd.xlane.f32.xlu1 %v746_v12 }
 0x5c4   : > { %v748_v13 = vpop.xlane.xlu1 %747 }
 0x5c5   : > { %3007 = vrcp.f32 %v748_v13 }
 0x5cf   : > { %v3008_v14 = vpop.eup %3007 }
 0x5d0   : > { %v750_v15 = vmul.f32 %v3008_v14, %v3006_v11  ;;  %v2913_v14 = vld [vmem:[#allocation9 + $0x10] ss:$52 sps:$4 sm:$0xff]  }
 0x5d2   : > { %v751_v17 = vpack.c.bf16 %v750_v15, %v750_v15  ;;  %v2915_v15 = vld [vmem:[#allocation9 + $0x14] ss:$52 sps:$4 sm:$0xff]  }
 0x5d4   : > { %2622 = vmatmul.mubr.msk.bf16.vlgmr.msra.gmra.mrb[8].mxu1 %vm582_vm3, %v751_v17  ;;  %v2916_v17 = vld [vmem:[#allocation9 + $0x78] ss:$52 sps:$4 sm:$0xff]  }
 0x5d5   : > { %2626 = vmatpush3.bf16.msra.mxu1 %v2897_v16  ;;  %2641 = vmatprep.mubr.msk.bf16.mxu1 %vm3249_vm0, %v3248_v19  ;;  %v2918_v16 = vld [vmem:[#allocation9 + $0x7c] ss:$52 sps:$4 sm:$0xff]  }
 0x5d6   : > { %2627 = vmatprep.subr.bf16.mxu1 %v3248_v19 }
 0x5d9   : > { %2628 = vmatpush3.bf16.msra.mxu1 %v2898_v18 }
 0x5da   : > { %2629 = vmatprep.subr.bf16.mxu1 %v3248_v19 }
 0x5dd   : > { %2630 = vmatpush3.bf16.msra.mxu1 %v2899_v24 }
 0x5de   : > { %2631 = vmatprep.subr.bf16.mxu1 %v3248_v19 }
 0x5e1   : > { %2632 = vmatpush3.bf16.msra.mxu1 %v2900_v25 }
 0x5e2   : > { %2633 = vmatprep.subr.bf16.mxu1 %v3248_v19 }
 0x5e5   : > { %2634 = vmatpush3.bf16.msra.mxu1 %v2901_v26 }
 0x5e6   : > { %2635 = vmatprep.subr.bf16.mxu1 %v3248_v19 }
 0x5e9   : > { %2636 = vmatpush3.bf16.msra.mxu1 %v2902_v27  ;;  %v2921_v27 = vld [vmem:[#allocation9 + $0xe4] ss:$52 sps:$4 sm:$0xff]  }
 0x5ea   : > { %2637 = vmatprep.subr.bf16.mxu1 %v3248_v19 }
 0x5ed   : > { %2638 = vmatpush3.bf16.msra.mxu1 %v2903_v28  ;;  %v2919_v28 = vld [vmem:[#allocation9 + $0xe0] ss:$52 sps:$4 sm:$0xff]  }
 0x5ee   : > { %2639 = vmatprep.subr.bf16.mxu1 %v3248_v19 }
 0x5f1   : > { %2640 = vmatpush3.bf16.msra.mxu1 %v2904_v29  ;;  %v2924_v29 = vld [vmem:[#allocation9 + $0x14c] ss:$52 sps:$4 sm:$0xff]  }
 0x5f2   : > { %1148 = vmatprep.subr.bf16.mxu1 %v2915_v15 }
 0x6a7   : > { %v797_v42 = vpop.f32.mrb[8].mxu1 }
 0x6a8   : > { %v798_v44 = vadd.f32 %v797_v42, %v756_v40  ;;  %v2623_v45 = vpop.f32.mrb[9].mxu1  ;;  %v2931_v40 = vld [vmem:[#allocation9 + $0x280] ss:$52 sps:$4 sm:$0xff]   ;;  %v2934_v42 = vld [vmem:[#allocation9 + $0x2e8] ss:$52 sps:$4 sm:$0xff]  }
 0x6a9   : > { %v800_v47 = vpop.f32.mrb[10].mxu1 }
 0x6aa   : > { %vm803_vm6 = vcmp.gt.f32.partialorder %v798_v44, 0.0  ;;  %v804_v48 = vmul.f32 %v798_v44, %v648_v41  ;;  %v2624_v49 = vpop.f32.mrb[11].mxu1  ;;  %v2936_v41 = vld [vmem:[#allocation9 + $0x2ec] ss:$52 sps:$4 sm:$0xff]  }
 0x6ac   : > { %v3595_v51 = vsel %vm803_vm6, %v798_v44, %v804_v48 }
 0x6ad   : > { %v806_v52 = vadd.f32 %v3595_v51, %v3593_v50 }
 0x6af   : > { %v807_v53 = vpack.c.bf16 %v806_v52, %v806_v52  ;;  %v1012_v52 = vstv %s2407_s21 }
 0x6b1   : > { %2642 = vmatmul.mubr.bf16.vlgmr.msra.gmra.mrb[12].mxu1 %v807_v53 }
 0x6b2   : > { %1180 = vmatprep.mubr.bf16.mxu1 %v3247_v0  ;;  %1149 = vmatpush1.bf16.msra.mxu1 %v2913_v14 }
 0x6b3   : > { %1150 = vmatprep.subr.bf16.mxu1 %v2918_v16 }
 0x6b6   : > { %1151 = vmatpush1.bf16.msra.mxu1 %v2916_v17 }
 0x6b7   : > { %1152 = vmatprep.subr.bf16.mxu1 %v2921_v27 }
 0x6ba   : > { %1153 = vmatpush1.bf16.msra.mxu1 %v2919_v28 }
 0x6bb   : > { %1154 = vmatprep.subr.bf16.mxu1 %v2924_v29 }
 0x6be   : > { %1155 = vmatpush1.bf16.msra.mxu1 %v2922_v30 }
 0x6bf   : > { %1156 = vmatprep.subr.bf16.mxu1 %v2927_v31 }
 0x6c2   : > { %1157 = vmatpush1.bf16.msra.mxu1 %v2925_v33 }
 0x6c3   : > { %1158 = vmatprep.subr.bf16.mxu1 %v2930_v34 }
 0x6c6   : > { %1159 = vmatpush1.bf16.msra.mxu1 %v2928_v36 }
 0x6c7   : > { %1160 = vmatprep.subr.bf16.mxu1 %v2933_v38 }
 0x6ca   : > { %1161 = vmatpush1.bf16.msra.mxu1 %v2931_v40 }
 0x6cb   : > { %1162 = vmatprep.subr.bf16.mxu1 %v2936_v41 }
 0x6ce   : > { %1163 = vmatpush1.bf16.msra.mxu1 %v2934_v42 }
 0x6cf   : > { %2687 = vmatprep.subr.bf16.mxu1 %v3248_v19 }
 0x784   : > { %v894_v60 = vpop.f32.mrb[12].mxu1 }
 0x785   : > { %v895_v61 = vadd.f32 %v894_v60, %v811_v59  ;;  %v2643_v62 = vpop.f32.mrb[13].mxu1  ;;  %v1192_v59 = vrot.slane %v3618_v57, %v3528_v22 }
 0x786   : > { %v897_v63 = vpop.f32.mrb[14].mxu1 }
 0x787   : > { %3009 = vtanh.f32 %v895_v61  ;;  %v2644_v1 = vpop.f32.mrb[15].mxu1 }
 0x791   : > { %v3010_v2 = vpop.eup %3009 }
 0x792   : > { %v901_v3 = vpack.c.bf16 %v3010_v2, %v3010_v2 }
 0x794   : > { %2662 = vmatmul.mubr.bf16.vlgmr.msra.gmra.mrb[4].mxu0 %v901_v3 }
 0x795   : > { %2667 = vmatprep.mubr.msk.f32.mxu0 %vm3249_vm0, %v3248_v19 }
 0x867   : > { %v984_v4 = vpop.f32.mrb[4].mxu0 }
 0x868   : > { %v990_v5 = vrot.slane %v984_v4, 4  ;;  %v2663_v6 = vpop.f32.mrb[5].mxu0 }
 0x869   : > { %v987_v7 = vpop.f32.mrb[6].mxu0 }
 0x86a   : > { %v991_v8 = vadd.f32 %v990_v5, %v984_v4  ;;  %v2664_v9 = vpop.f32.mrb[7].mxu0 }
 0x86c   : > { %v992_v10 = vrot.slane %v991_v8, 2 }
 0x86e   : > { %v993_v23 = vadd.f32 %v992_v10, %v991_v8  ;;  %v1345_v10 = vrot.slane %v3618_v57, %v653_v46 }
 0x870   : > { %v994_v11 = vrot.slane %v993_v23, 1 }
 0x872   : > { %v995_v12 = vadd.f32 %v994_v11, %v993_v23 }
 0x874   : > { %v997_v13 = vmul.f32 0.125, %v995_v12 }
 0x876   : > { %998 = vmax.xlane.f32.xlu0 %v997_v13 }
 0x903   : > { %v999_v18 = vpop.xlane.xlu0 %998 }
 0x904   : > { %v1000_v24 = vsub.f32 %v997_v13, %v999_v18 }
 0x906   : > { %v1001_v25 = vmul.f32 1.442695, %v1000_v24 }
 0x908   : > { %3011 = vpow2.f32 %v1001_v25 }
 0x912   : > { %v3012_v26 = vpop.eup %3011 }
 0x913   : > { %1003 = vadd.xlane.f32.xlu1 %v3012_v26 }
 0x9a0   : > { %v1004_v43 = vpop.xlane.xlu1 %1003 }
 0x9a1   : > { %3013 = vrcp.f32 %v1004_v43 }
 0x9ab   : > { %v3014_v44 = vpop.eup %3013 }
 0x9ac   : > { %v1006_v45 = vmul.f32 %v3014_v44, %v3012_v26  ;;  %v1350_v26 = vrot.slane %v3618_v57, 1 }
 0x9ae   : > { %v1008_v47 = vsub.f32 1.0, %v1006_v45  ;;  %v1007_v48 = vmul.f32 %v1006_v45, %v3593_v50 }
 0x9b0   : > { %v1009_v49 = vmul.f32 %v1008_v47, %v3595_v51 }
 0x9b2   : > { %v1010_v53 = vadd.f32 %v1009_v49, %v1007_v48 }
 0x9b4   : > { %vm1011_vm7 = vcmp.gt.f32.partialorder %v1010_v53, 0.0  ;;  %v1013_v54 = vmul.f32 %v1012_v52, %v1010_v53 }
 0x9b6   : > { %v1014_v55 = vsel %vm1011_vm7, %v1010_v53, %v1013_v54  ;;  %v2937_v53 = vld [vmem:[#allocation9 + $0x18] ss:$52 sps:$4 sm:$0xff]   ;;  %v2938_v54 = vld [vmem:[#allocation9 + $0x80] ss:$52 sps:$4 sm:$0xff]  }
 0x9b7   : > { %v3613_v56 = vpack.c.bf16 %v1014_v55, %v1014_v55  ;;  %v2939_v55 = vld [vmem:[#allocation9 + $0xe8] ss:$52 sps:$4 sm:$0xff]  }
 0x9b9   : > { %1181 = vmatmul.mubr.bf16.vlgmr.msra.gmra.mrb[16].mxu1 %v3613_v56 }
 0x9ba   : > { %2703 = vmatprep.mubr.msk.bf16.mxu1 %vm3249_vm0, %v3248_v19  ;;  %2688 = vmatpush3.bf16.msra.mxu1 %v2937_v53  ;;  %v2988_v53 = vld [vmem:[#allocation9 + $0x29c] ss:$52 sps:$4 sm:$0xff]  }
 0x9bb   : > { %2689 = vmatprep.subr.bf16.mxu1 %v3248_v19 }
 0x9be   : > { %2690 = vmatpush3.bf16.msra.mxu1 %v2938_v54  ;;  %v2990_v54 = vld [vmem:[#allocation9 + $0x304] ss:$52 sps:$4 sm:$0xff]  }
 0x9bf   : > { %2691 = vmatprep.subr.bf16.mxu1 %v3248_v19 }
 0x9c2   : > { %2692 = vmatpush3.bf16.msra.mxu1 %v2939_v55  ;;  %v1502_v55 = vrot.slane %v3618_v57, %v810_v58  ;;  %v2985_v58 = vld [vmem:[#allocation9 + $0x160] ss:$52 sps:$4 sm:$0xff]  }
 0x9c3   : > { %2693 = vmatprep.subr.bf16.mxu1 %v3248_v19 }
 0xa8c   : > { %v1182_v50 = vpop.f32.mrb[16].mxu1 }
 0xa8d   : > { %v1287_v60 = vpack.c.bf16 %v1182_v50, %v1182_v50  ;;  %v1184_v51 = vpop.f32.mrb[17].mxu1  ;;  %2666 = vmatpush3.xpose.msra.mxu0 %v1182_v50  ;;  %v1193_v61 = vmul.f32 %v1192_v59, %v1182_v50  ;;  %v2941_v59 = vld [vmem:[#allocation9 + $0x1b8] ss:$52 sps:$4 sm:$0xff]   ;;  %v2942_v50 = vld [vmem:[#allocation9 + $0x220] ss:$52 sps:$4 sm:$0xff]  }
 0xa8e   : > { %v1186_v62 = vpop.f32.mrb[18].mxu1  ;;  %2670 = vmatprep.subr.bf16.mxu0 %v3248_v19  ;;  %v1346_v11 = vmul.f32 %v1345_v10, %v1184_v51  ;;  %v1443_v46 = vpack.c.bf16 %v1184_v51, %v1184_v51  ;;  %v1339_v10 = vstv %s2442_s22 }
 0xa8f   : > { %1194 = vadd.xlane.f32.xlu0 %v1193_v61  ;;  %v1187_v63 = vpop.f32.mrb[19].mxu1  ;;  %v1296_v1 = vsel %vm603_vm1, %v1287_v60, 0 }
 0xa90   : > { %2668 = vmatmul.mubr.f32.vlgmr.msra.gmra.mrb[8].mxu0 %v3618_v57  ;;  %v1452_v27 = vsel %vm603_vm1, %v1443_v46, 0  ;;  %v2943_v63 = vld [vmem:[#allocation9 + $0x288] ss:$52 sps:$4 sm:$0xff]  }
 0xa91   : > { %2671 = vmatpush3.bf16.msra.mxu0 %v1296_v1  ;;  %2672 = vmatprep.mubr.msk.bf16.mxu0 %vm3249_vm0, %v3248_v19  ;;  %v2944_v1 = vld [vmem:[#allocation9 + $0x2f0] ss:$52 sps:$4 sm:$0xff]   ;;  %v2948_v46 = vld [vmem:[#allocation9 + $0x88] ss:$52 sps:$4 sm:$0xff]  }
 0xa92   : > { %2676 = vmatprep.subr.mxu0 %v3248_v19 }
 0xb1c   : > { %v1195_v5 = vpop.xlane.xlu0 %1194 }
 0xb63   : > { %v1262_v2 = vpop.f32.mrb[8].mxu0 }
 0xb64   : > { %v1269_v3 = vrot.slane %v1262_v2, %v3541_v32  ;;  %v2669_v4 = vpop.f32.mrb[9].mxu0  ;;  %v2947_v2 = vld [vmem:[#allocation9 + $0x24] ss:$52 sps:$4 sm:$0xff]  }
 0xb65   : > { %v2970_v4 = vld [vmem:[#allocation9 + $0x84] ss:$52 sps:$4 sm:$0xff]  }
 0xb66   : > { %v1270_v6 = vadd.f32 %v1269_v3, %v1195_v5  ;;  %v2969_v3 = vld [vmem:[#allocation9 + $0x1c] ss:$52 sps:$4 sm:$0xff]   ;;  %v2971_v5 = vld [vmem:[#allocation9 + $0xec] ss:$52 sps:$4 sm:$0xff]  }
 0xb68   : > { %v1272_v7 = vmul.f32 0.2, %v1270_v6  ;;  %vm1271_vm8 = vcmp.gt.f32.partialorder %v1270_v6, 0.0 }
 0xb6a   : > { %v1273_v8 = vsel %vm1271_vm8, %v1270_v6, %v1272_v7  ;;  %v2972_v6 = vld [vmem:[#allocation9 + $0x154] ss:$52 sps:$4 sm:$0xff]   ;;  %v1291_v7 = vrot.slane %v3618_v57, %v598_v35 }
 0xb6b   : > { %v1274_v9 = vadd.f32 %v1273_v8, %v3546_v39 }
 0xb6d   : > { %v1275_v23 = vsel %vm582_vm3, %v1274_v9, -inf }
 0xb6e   : > { %1276 = vmax.xlane.f32.xlu1 %v1275_v23 }
 0xb72   : > { %1347 = vadd.xlane.f32.xlu1 %v1346_v11 }
 0xbfb   : > { %v1277_v12 = vpop.xlane.xlu1 %1276 }
 0xbfc   : > { %v1278_v13 = vsub.f32 %v1274_v9, %v1277_v12  ;;  %v1447_v9 = vrot.slane %v3618_v57, %v755_v37  ;;  %v2950_v37 = vld [vmem:[#allocation9 + $0x8c] ss:$52 sps:$4 sm:$0xff]   ;;  %v3701_v57 = vld [vmem:[#allocation10 + $0x10] sm:$0xff] }
 0xbfe   : > { %v1279_v14 = vmul.f32 1.442695, %v1278_v13 }
 0xbff   : > { %v1348_v38 = vpop.xlane.xlu1 %1347 }
 0xc00   : > { %3015 = vpow2.f32 %v1279_v14 }
 0xc0a   : > { %v3016_v15 = vpop.eup %3015 }
 0xc0b   : > { %v1281_v16 = vsel %vm582_vm3, %v3016_v15, 0.0 }
 0xc0c   : > { %1282 = vadd.xlane.f32.xlu0 %v1281_v16 }
 0xc99   : > { %v1283_v17 = vpop.xlane.xlu0 %1282 }
 0xc9a   : > { %3017 = vrcp.f32 %v1283_v17 }
 0xca4   : > { %v3018_v18 = vpop.eup %3017 }
 0xca5   : > { %v1285_v24 = vmul.f32 %v3018_v18, %v3016_v15 }
 0xca7   : > { %v1286_v25 = vpack.c.bf16 %v1285_v24, %v1285_v24  ;;  %v2945_v24 = vld [vmem:[#allocation9 + $0x20] ss:$52 sps:$4 sm:$0xff]  }
 0xca9   : > { %2673 = vmatmul.mubr.msk.bf16.vlgmr.msra.gmra.mrb[12].mxu0 %vm582_vm3, %v1286_v25 }
 0xcaa   : > { %2677 = vmatpush3.xpose.msra.mxu0 %v1184_v51  ;;  %2678 = vmatprep.mubr.msk.f32.mxu0 %vm3249_vm0, %v3248_v19 }
 0xcab   : > { %2681 = vmatprep.subr.bf16.mxu0 %v3248_v19 }
 0xcb1   : > { %2679 = vmatmul.mubr.f32.vlgmr.msra.gmra.mrb[10].mxu0 %v1350_v26  ;;  %v2953_v26 = vld [vmem:[#allocation9 + $0xf4] ss:$52 sps:$4 sm:$0xff]  }
 0xcb2   : > { %2682 = vmatpush3.bf16.msra.mxu0 %v1452_v27  ;;  %2683 = vmatprep.mubr.msk.bf16.mxu0 %vm3249_vm0, %v3248_v19  ;;  %v2951_v27 = vld [vmem:[#allocation9 + $0xf0] ss:$52 sps:$4 sm:$0xff]  }
 0xcb3   : > { %2707 = vmatprep.subr.bf16.mxu0 %v3248_v19 }
 0xd7c   : > { %v3644_v28 = vpop.f32.mrb[12].mxu0 }
 0xd7d   : > { %v2674_v29 = vpop.f32.mrb[13].mxu0  ;;  %v1333_v8 = vadd.f32 %v3644_v28, %v1291_v7  ;;  %v2956_v28 = vld [vmem:[#allocation9 + $0x15c] ss:$52 sps:$4 sm:$0xff]   ;;  %v1899_v7 = vstv %s2494_s17 }
 0xd7e   : > { %v1335_v30 = vpop.f32.mrb[14].mxu0  ;;  %v2954_v29 = vld [vmem:[#allocation9 + $0x158] ss:$52 sps:$4 sm:$0xff]  }
 0xd7f   : > { %v2675_v31 = vpop.f32.mrb[15].mxu0  ;;  %v1340_v11 = vmul.f32 %v1339_v10, %v1333_v8  ;;  %vm1338_vm10 = vcmp.gt.f32.partialorder %v1333_v8, 0.0  ;;  %v2959_v30 = vld [vmem:[#allocation9 + $0x1c4] ss:$52 sps:$4 sm:$0xff]  }
 0xd80   : > { %v2957_v31 = vld [vmem:[#allocation9 + $0x1c0] ss:$52 sps:$4 sm:$0xff]  }
 0xd81   : > { %v3671_v17 = vsel %vm1338_vm10, %v1333_v8, %v1340_v11  ;;  %v2989_v8 = vld [vmem:[#allocation9 + $0x230] ss:$52 sps:$4 sm:$0xff]  }
 0xd84   : > { %v1418_v33 = vpop.f32.mrb[10].mxu0 }
 0xd85   : > { %v1425_v34 = vrot.slane %v1418_v33, %v3541_v32  ;;  %v2680_v36 = vpop.f32.mrb[11].mxu0  ;;  %v2962_v33 = vld [vmem:[#allocation9 + $0x22c] ss:$52 sps:$4 sm:$0xff]  }
 0xd86   : > { %v2965_v36 = vld [vmem:[#allocation9 + $0x294] ss:$52 sps:$4 sm:$0xff]  }
 0xd87   : > { %v1426_v40 = vadd.f32 %v1425_v34, %v1348_v38  ;;  %v2960_v34 = vld [vmem:[#allocation9 + $0x228] ss:$52 sps:$4 sm:$0xff]  }
 0xd88   : > { %v2968_v38 = vld [vmem:[#allocation9 + $0x2fc] ss:$52 sps:$4 sm:$0xff]  }
 0xd89   : > { %v1428_v41 = vmul.f32 0.2, %v1426_v40  ;;  %vm1427_vm9 = vcmp.gt.f32.partialorder %v1426_v40, 0.0 }
 0xd8b   : > { %v1429_v42 = vsel %vm1427_vm9, %v1426_v40, %v1428_v41  ;;  %v2966_v40 = vld [vmem:[#allocation9 + $0x2f8] ss:$52 sps:$4 sm:$0xff]   ;;  %v2973_v41 = vld [vmem:[#allocation9 + $0x1bc] ss:$52 sps:$4 sm:$0xff]  }
 0xd8c   : > { %v1430_v43 = vadd.f32 %v1429_v42, %v3546_v39  ;;  %v2940_v39 = vld [vmem:[#allocation9 + $0x150] ss:$52 sps:$4 sm:$0xff]  }
 0xd8d   : > { %2694 = vmatpush3.bf16.msra.mxu1 %v2940_v39  ;;  %v2974_v42 = vld [vmem:[#allocation9 + $0x224] ss:$52 sps:$4 sm:$0xff]  }
 0xd8e   : > { %v1431_v44 = vsel %vm582_vm3, %v1430_v43, -inf  ;;  %2695 = vmatprep.subr.bf16.mxu1 %v3248_v19 }
 0xd8f   : > { %1432 = vmax.xlane.f32.xlu0 %v1431_v44  ;;  %v2976_v44 = vld [vmem:[#allocation9 + $0x2c] ss:$52 sps:$4 sm:$0xff]  }
 0xd91   : > { %2696 = vmatpush3.bf16.msra.mxu1 %v2941_v59 }
 0xd92   : > { %2697 = vmatprep.subr.bf16.mxu1 %v3248_v19 }
 0xd95   : > { %2698 = vmatpush3.bf16.msra.mxu1 %v2942_v50 }
 0xd96   : > { %2699 = vmatprep.subr.bf16.mxu1 %v3248_v19 }
 0xd99   : > { %2700 = vmatpush3.bf16.msra.mxu1 %v2943_v63 }
 0xd9a   : > { %2701 = vmatprep.subr.bf16.mxu1 %v3248_v19 }
 0xd9d   : > { %2702 = vmatpush3.bf16.msra.mxu1 %v2944_v1  ;;  %v2981_v1 = vld [vmem:[#allocation9 + $0x90] ss:$52 sps:$4 sm:$0xff]  }
 0xd9e   : > { %1851 = vmatprep.subr.bf16.mxu1 %v2947_v2  ;;  %v2983_v2 = vld [vmem:[#allocation9 + $0xf8] ss:$52 sps:$4 sm:$0xff]  }
 0xe1c   : > { %v1433_v45 = vpop.xlane.xlu0 %1432 }
 0xe1d   : > { %v1434_v47 = vsub.f32 %v1430_v43, %v1433_v45  ;;  %v2975_v43 = vld [vmem:[#allocation9 + $0x28c] ss:$52 sps:$4 sm:$0xff]   ;;  %v2977_v45 = vld [vmem:[#allocation9 + $0x2f4] ss:$52 sps:$4 sm:$0xff]  }
 0xe1f   : > { %v1435_v48 = vmul.f32 1.442695, %v1434_v47  ;;  %v2980_v47 = vld [vmem:[#allocation9 + $0xfc] ss:$52 sps:$4 sm:$0xff]  }
 0xe21   : > { %3019 = vpow2.f32 %v1435_v48  ;;  %v2982_v48 = vld [vmem:[#allocation9 + $0x164] ss:$52 sps:$4 sm:$0xff]  }
 0xe2b   : > { %v3020_v49 = vpop.eup %3019 }
 0xe2c   : > { %v1437_v52 = vsel %vm582_vm3, %v3020_v49, 0.0 }
 0xe2d   : > { %1438 = vadd.xlane.f32.xlu1 %v1437_v52  ;;  %v2986_v52 = vld [vmem:[#allocation9 + $0x234] ss:$52 sps:$4 sm:$0xff]  }
 0xeba   : > { %v1439_v60 = vpop.xlane.xlu1 %1438 }
 0xebb   : > { %3021 = vrcp.f32 %v1439_v60 }
 0xec5   : > { %v3022_v51 = vpop.eup %3021 }
 0xec6   : > { %v1441_v61 = vmul.f32 %v3022_v51, %v3020_v49  ;;  %v2984_v49 = vld [vmem:[#allocation9 + $0x1cc] ss:$52 sps:$4 sm:$0xff]  }
 0xec8   : > { %v1442_v62 = vpack.c.bf16 %v1441_v61, %v1441_v61 }
 0xeca   : > { %2684 = vmatmul.mubr.msk.bf16.vlgmr.msra.gmra.mrb[16].mxu0 %vm582_vm3, %v1442_v62  ;;  %v2979_v62 = vld [vmem:[#allocation9 + $0x28] ss:$52 sps:$4 sm:$0xff]  }
 0xecb   : > { %2723 = vmatprep.mubr.msk.bf16.mxu0 %vm3249_vm0, %v3248_v19  ;;  %2708 = vmatpush3.bf16.msra.mxu0 %v2969_v3  ;;  %v2987_v3 = vld [vmem:[#allocation9 + $0x1c8] ss:$52 sps:$4 sm:$0xff]  }
 0xecc   : > { %2709 = vmatprep.subr.bf16.mxu0 %v3248_v19 }
 0xecf   : > { %2710 = vmatpush3.bf16.msra.mxu0 %v2970_v4  ;;  %v1895_v4 = vrot.slane %v3701_v57, %v3541_v32  ;;  %v2992_v32 = vld [vmem:[#allocation9 + $0x300] ss:$52 sps:$4 sm:$0xff]  }
 0xed0   : > { %2711 = vmatprep.subr.bf16.mxu0 %v3248_v19 }
 0xed3   : > { %2712 = vmatpush3.bf16.msra.mxu0 %v2971_v5 }
 0xed4   : > { %2713 = vmatprep.subr.bf16.mxu0 %v3248_v19 }
 0xed7   : > { %2714 = vmatpush3.bf16.msra.mxu0 %v2972_v6 }
 0xed8   : > { %2715 = vmatprep.subr.bf16.mxu0 %v3248_v19 }
 0xedb   : > { %2716 = vmatpush3.bf16.msra.mxu0 %v2973_v41 }
 0xedc   : > { %2717 = vmatprep.subr.bf16.mxu0 %v3248_v19 }
 0xedf   : > { %2718 = vmatpush3.bf16.msra.mxu0 %v2974_v42  ;;  %v1994_v42 = vsub.s32 1, %v3525_v21 }
 0xee0   : > { %2719 = vmatprep.subr.bf16.mxu0 %v3248_v19 }
 0xee3   : > { %2720 = vmatpush3.bf16.msra.mxu0 %v2975_v43  ;;  %v1995_v43 = vrot.slane %v3701_v57, %v1994_v42 }
 0xee4   : > { %2721 = vmatprep.subr.bf16.mxu0 %v3248_v19 }
 0xee7   : > { %2722 = vmatpush3.bf16.msra.mxu0 %v2977_v45 }
 0xee8   : > { %2727 = vmatprep.subr.bf16.mxu0 %v3248_v19 }
 0xf9d   : > { %v1488_v23 = vpop.f32.mrb[16].mxu0 }
 0xf9e   : > { %v1489_v12 = vadd.f32 %v1488_v23, %v1447_v9  ;;  %v2685_v13 = vpop.f32.mrb[17].mxu0 }
 0xf9f   : > { %v1491_v14 = vpop.f32.mrb[18].mxu0 }
 0xfa0   : > { %vm1494_vm11 = vcmp.gt.f32.partialorder %v1489_v12, 0.0  ;;  %v1495_v15 = vmul.f32 %v1489_v12, %v1339_v10  ;;  %v2686_v16 = vpop.f32.mrb[19].mxu0 }
 0xfa1   : > { %v2993_v16 = vld [vmem:[#allocation9 + $0x30] ss:$52 sps:$4 sm:$0xff]  }
 0xfa2   : > { %v3673_v18 = vsel %vm1494_vm11, %v1489_v12, %v1495_v15  ;;  %v2991_v12 = vld [vmem:[#allocation9 + $0x298] ss:$52 sps:$4 sm:$0xff]  }
 0xfa3   : > { %v1497_v35 = vadd.f32 %v3673_v18, %v3671_v17 }
 0xfa5   : > { %v1498_v25 = vpack.c.bf16 %v1497_v35, %v1497_v35  ;;  %v2994_v35 = vld [vmem:[#allocation9 + $0x98] ss:$52 sps:$4 sm:$0xff]  }
 0xfa7   : > { %2704 = vmatmul.mubr.bf16.vlgmr.msra.gmra.mrb[20].mxu1 %v1498_v25  ;;  %v2996_v25 = vld [vmem:[#allocation9 + $0x168] ss:$52 sps:$4 sm:$0xff]  }
 0xfa8   : > { %1852 = vmatpush1.bf16.msra.mxu1 %v2945_v24  ;;  %1883 = vmatprep.mubr.bf16.mxu1 %v3247_v0  ;;  %v2963_v0 = vld [vmem:[#allocation9 + $0x290] ss:$52 sps:$4 sm:$0xff]   ;;  %v2995_v24 = vld [vmem:[#allocation9 + $0x100] ss:$52 sps:$4 sm:$0xff]  }
 0xfa9   : > { %1853 = vmatprep.subr.bf16.mxu1 %v2950_v37  ;;  %v2997_v37 = vld [vmem:[#allocation9 + $0x1d0] ss:$52 sps:$4 sm:$0xff]  }
 0xfac   : > { %1854 = vmatpush1.bf16.msra.mxu1 %v2948_v46  ;;  %v2998_v46 = vld [vmem:[#allocation9 + $0x238] ss:$52 sps:$4 sm:$0xff]  }
 0xfad   : > { %1855 = vmatprep.subr.bf16.mxu1 %v2953_v26  ;;  %v2999_v26 = vld [vmem:[#allocation9 + $0x2a0] ss:$52 sps:$4 sm:$0xff]  }
 0xfb0   : > { %1856 = vmatpush1.bf16.msra.mxu1 %v2951_v27  ;;  %v3000_v27 = vld [vmem:[#allocation9 + $0x308] ss:$52 sps:$4 sm:$0xff]  }
 0xfb1   : > { %1857 = vmatprep.subr.bf16.mxu1 %v2956_v28 }
 0xfb4   : > { %1858 = vmatpush1.bf16.msra.mxu1 %v2954_v29 }
 0xfb5   : > { %1859 = vmatprep.subr.bf16.mxu1 %v2959_v30 }
 0xfb8   : > { %1860 = vmatpush1.bf16.msra.mxu1 %v2957_v31 }
 0xfb9   : > { %1861 = vmatprep.subr.bf16.mxu1 %v2962_v33 }
 0xfbc   : > { %1862 = vmatpush1.bf16.msra.mxu1 %v2960_v34 }
 0xfbd   : > { %1863 = vmatprep.subr.bf16.mxu1 %v2965_v36 }
 0xfc0   : > { %1864 = vmatpush1.bf16.msra.mxu1 %v2963_v0 }
 0xfc1   : > { %1865 = vmatprep.subr.bf16.mxu1 %v2968_v38 }
 0xfc4   : > { %1866 = vmatpush1.bf16.msra.mxu1 %v2966_v40 }
 0xfc5   : > { %2747 = vmatprep.subr.bf16.mxu1 %v3248_v19 }
 0xfc7   : > { %1884 = vmatmul.mubr.bf16.vlgmr.msra.gmra.mrb[24].mxu1 %v3613_v56  ;;  %v2978_v56 = vld [vmem:[#allocation9 + $0x94] ss:$52 sps:$4 sm:$0xff]  }
 0xfc8   : > { %2763 = vmatprep.mubr.msk.bf16.mxu1 %vm3249_vm0, %v3248_v19  ;;  %2748 = vmatpush3.bf16.msra.mxu1 %v2976_v44  ;;  %v2086_v44 = vstv %s2511_s20 }
 0xfc9   : > { %2749 = vmatprep.subr.bf16.mxu1 %v3248_v19 }
 0xfcc   : > { %2750 = vmatpush3.bf16.msra.mxu1 %v2978_v56 }
 0xfcd   : > { %2751 = vmatprep.subr.bf16.mxu1 %v3248_v19 }
 0xfd0   : > { %2752 = vmatpush3.bf16.msra.mxu1 %v2980_v47 }
 0xfd1   : > { %2753 = vmatprep.subr.bf16.mxu1 %v3248_v19 }
 0xfd4   : > { %2754 = vmatpush3.bf16.msra.mxu1 %v2982_v48 }
 0xfd5   : > { %2755 = vmatprep.subr.bf16.mxu1 %v3248_v19 }
 0xfd8   : > { %2756 = vmatpush3.bf16.msra.mxu1 %v2984_v49 }
 0xfd9   : > { %2757 = vmatprep.subr.bf16.mxu1 %v3248_v19 }
 0xfdc   : > { %2758 = vmatpush3.bf16.msra.mxu1 %v2986_v52 }
 0xfdd   : > { %2759 = vmatprep.subr.bf16.mxu1 %v3248_v19 }
 0xfe0   : > { %2760 = vmatpush3.bf16.msra.mxu1 %v2988_v53 }
 0xfe1   : > { %2761 = vmatprep.subr.bf16.mxu1 %v3248_v19 }
 0xfe4   : > { %2762 = vmatpush3.bf16.msra.mxu1 %v2990_v54 }
0x107a   : > { %v1585_v39 = vpop.f32.mrb[20].mxu1 }
0x107b   : > { %v1586_v59 = vadd.f32 %v1585_v39, %v1502_v55  ;;  %v2705_v50 = vpop.f32.mrb[21].mxu1 }
0x107c   : > { %v1588_v60 = vpop.f32.mrb[22].mxu1 }
0x107d   : > { %3023 = vtanh.f32 %v1586_v59  ;;  %v2706_v51 = vpop.f32.mrb[23].mxu1 }
0x107e   : > { %v3029_v51 = vld [vmem:[%s265_s26] sm:$0xff]  ;;  %s2242_s26 = scalar_lea.sflag [#allocation6], %s3490_s11 }
0x1087   : > { %v3024_v61 = vpop.eup %3023 }
0x1088   : > { %v1592_v63 = vpack.c.bf16 %v3024_v61, %v3024_v61 }
0x108a   : > { %2724 = vmatmul.mubr.bf16.vlgmr.msra.gmra.mrb[20].mxu0 %v1592_v63 }
0x108b   : > { %2728 = vmatpush3.bf16.msra.mxu0 %v2979_v62  ;;  %2743 = vmatprep.mubr.msk.bf16.mxu0 %vm3249_vm0, %v3248_v19 }
0x108c   : > { %2729 = vmatprep.subr.bf16.mxu0 %v3248_v19 }
0x108f   : > { %2730 = vmatpush3.bf16.msra.mxu0 %v2981_v1  ;;  %v2093_v1 = vrot.slane %v3701_v57, %v3528_v22 }
0x1090   : > { %2731 = vmatprep.subr.bf16.mxu0 %v3248_v19 }
0x1093   : > { %2732 = vmatpush3.bf16.msra.mxu0 %v2983_v2 }
0x1094   : > { %2733 = vmatprep.subr.bf16.mxu0 %v3248_v19 }
0x1097   : > { %2734 = vmatpush3.bf16.msra.mxu0 %v2985_v58 }
0x1098   : > { %2735 = vmatprep.subr.bf16.mxu0 %v3248_v19 }
0x109a   : > { %v3706_v5 = vpop.f32.mrb[24].mxu1 }
0x109b   : > { %v1887_v6 = vpop.f32.mrb[25].mxu1  ;;  %2736 = vmatpush3.bf16.msra.mxu0 %v2987_v3  ;;  %v1902_v15 = vpack.c.bf16 %v3706_v5, %v3706_v5  ;;  %v2184_v61 = vsub.f32 %v3706_v5, %v3029_v51 }
0x109c   : > { %v1896_v9 = vadd.f32 %v1895_v4, %v1887_v6  ;;  %v1889_v10 = vpop.f32.mrb[26].mxu1  ;;  %2737 = vmatprep.subr.bf16.mxu0 %v3248_v19 }
0x109d   : > { %v1890_v23 = vpop.f32.mrb[27].mxu1  ;;  %v2187_v63 = vmul.f32 %v2184_v61, %v2184_v61 }
0x109e   : > { %vm1898_vm12 = vcmp.gt.f32.partialorder %v1896_v9, 0.0  ;;  %v1900_v11 = vmul.f32 %v1899_v7, %v1896_v9 }
0x109f   : > { %2738 = vmatpush3.bf16.msra.mxu0 %v2989_v8 }
0x10a0   : > { %v1901_v13 = vsel %vm1898_vm12, %v1896_v9, %v1900_v11  ;;  %2739 = vmatprep.subr.bf16.mxu0 %v3248_v19  ;;  %v1702_v11 = vstv %s2443_s4 }
0x10a1   : > { %v1991_v14 = vpack.c.bf16 %v1901_v13, %v1901_v13 }
0x10a3   : > { %2740 = vmatpush3.bf16.msra.mxu0 %v2991_v12  ;;  %2764 = vmatmul.mubr.bf16.vlgmr.msra.gmra.mrb[28].mxu1 %v1991_v14 }
0x10a4   : > { %2741 = vmatprep.subr.bf16.mxu0 %v3248_v19 }
0x10a7   : > { %2742 = vmatpush3.bf16.msra.mxu0 %v2992_v32 }
0x10a8   : > { %2767 = vmatprep.subr.bf16.mxu0 %v3248_v19 }
0x10aa   : > { %2744 = vmatmul.mubr.bf16.vlgmr.msra.gmra.mrb[24].mxu0 %v1902_v15 }
0x10ab   : > { %2783 = vmatprep.mubr.msk.bf16.mxu0 %vm3249_vm0, %v3248_v19  ;;  %2768 = vmatpush3.bf16.msra.mxu0 %v2993_v16 }
0x10ac   : > { %2769 = vmatprep.subr.bf16.mxu0 %v3248_v19 }
0x10af   : > { %2770 = vmatpush3.bf16.msra.mxu0 %v2994_v35 }
0x10b0   : > { %2771 = vmatprep.subr.bf16.mxu0 %v3248_v19 }
0x10b3   : > { %2772 = vmatpush3.bf16.msra.mxu0 %v2995_v24 }
0x10b4   : > { %2773 = vmatprep.subr.bf16.mxu0 %v3248_v19 }
0x10b7   : > { %2774 = vmatpush3.bf16.msra.mxu0 %v2996_v25 }
0x10b8   : > { %2775 = vmatprep.subr.bf16.mxu0 %v3248_v19 }
0x10bb   : > { %2776 = vmatpush3.bf16.msra.mxu0 %v2997_v37 }
0x10bc   : > { %2777 = vmatprep.subr.bf16.mxu0 %v3248_v19 }
0x10bf   : > { %2778 = vmatpush3.bf16.msra.mxu0 %v2998_v46 }
0x10c0   : > { %2779 = vmatprep.subr.bf16.mxu0 %v3248_v19 }
0x10c3   : > { %2780 = vmatpush3.bf16.msra.mxu0 %v2999_v26 }
0x10c4   : > { %2781 = vmatprep.subr.bf16.mxu0 %v3248_v19 }
0x10c7   : > { %2782 = vmatpush3.bf16.msra.mxu0 %v3000_v27 }
0x115d   : > { %v1675_v28 = vpop.f32.mrb[20].mxu0 }
0x115e   : > { %v1681_v29 = vrot.slane %v1675_v28, 4  ;;  %v2725_v30 = vpop.f32.mrb[21].mxu0 }
0x115f   : > { %v1678_v31 = vpop.f32.mrb[22].mxu0 }
0x1160   : > { %v1682_v33 = vadd.f32 %v1681_v29, %v1675_v28  ;;  %v2726_v34 = vpop.f32.mrb[23].mxu0 }
0x1162   : > { %v1683_v36 = vrot.slane %v1682_v33, 2 }
0x1164   : > { %v1684_v0 = vadd.f32 %v1683_v36, %v1682_v33 }
0x1166   : > { %v1685_v38 = vrot.slane %v1684_v0, 1 }
0x1168   : > { %v1686_v40 = vadd.f32 %v1685_v38, %v1684_v0 }
0x116a   : > { %v1687_v41 = vmul.f32 0.125, %v1686_v40 }
0x116c   : > { %1688 = vmax.xlane.f32.xlu0 %v1687_v41 }
0x1176   : > { %v2078_v19 = vpop.f32.mrb[28].mxu1 }
0x1177   : > { %v2079_v45 = vadd.f32 %v2078_v19, %v1995_v43  ;;  %v2765_v56 = vpop.f32.mrb[29].mxu1 }
0x1178   : > { %v2081_v47 = vpop.f32.mrb[30].mxu1 }
0x1179   : > { %vm2085_vm13 = vcmp.gt.f32.partialorder %v2079_v45, 0.0  ;;  %v2087_v48 = vmul.f32 %v2086_v44, %v2079_v45  ;;  %v2766_v49 = vpop.f32.mrb[31].mxu1 }
0x117b   : > { %v2088_v52 = vsel %vm2085_vm13, %v2079_v45, %v2087_v48 }
0x117c   : > { %v2089_v53 = vpack.c.bf16 %v2088_v52, %v2088_v52 }
0x117d   : > { %v1985_v54 = vpop.f32.mrb[24].mxu0 }
0x117e   : > { %v2745_v55 = vpop.f32.mrb[25].mxu0  ;;  %2784 = vmatmul.mubr.bf16.vlgmr.msra.gmra.mrb[28].mxu0 %v2089_v53  ;;  %v2185_v14 = vsub.f32 %v1985_v54, %v3029_v51 }
0x117f   : > { %v1988_v39 = vpop.f32.mrb[26].mxu0 }
0x1180   : > { %v2746_v59 = vpop.f32.mrb[27].mxu0  ;;  %v2188_v15 = vmul.f32 %v2185_v14, %v2185_v14 }
0x11f9   : > { %v1689_v21 = vpop.xlane.xlu0 %1688 }
0x11fa   : > { %v1690_v50 = vsub.f32 %v1687_v41, %v1689_v21 }
0x11fc   : > { %v1691_v60 = vmul.f32 1.442695, %v1690_v50 }
0x11fe   : > { %3025 = vpow2.f32 %v1691_v60 }
0x1208   : > { %v3026_v62 = vpop.eup %3025 }
0x1209   : > { %1693 = vadd.xlane.f32.xlu1 %v3026_v62 }
0x120d   : > { %2191 = vadd.xlane.f32.xlu1 %v2187_v63 }
0x1251   : > { %v2176_v2 = vpop.f32.mrb[28].mxu0 }
0x1252   : > { %v2177_v58 = vadd.f32 %v2176_v2, %v2093_v1  ;;  %v2785_v3 = vpop.f32.mrb[29].mxu0 }
0x1253   : > { %v2179_v4 = vpop.f32.mrb[30].mxu0 }
0x1254   : > { %2182 = vst [vmem:[%s311_s27] sm:$0xff] %v2177_v58  ;;  %v2786_v6 = vpop.f32.mrb[31].mxu0 }
0x1296   : > { %v1694_v7 = vpop.xlane.xlu1 %1693 }
0x1297   : > { %3027 = vrcp.f32 %v1694_v7 }
0x129a   : > { %v2192_v16 = vpop.xlane.xlu1 %2191 }
0x12a1   : > { %v3028_v8 = vpop.eup %3027 }
0x12a2   : > { %v1696_v5 = vmul.f32 %v3028_v8, %v3026_v62 }
0x12a4   : > { %v1698_v9 = vsub.f32 1.0, %v1696_v5  ;;  %v1697_v10 = vmul.f32 %v1696_v5, %v3671_v17  ;;  %v2207_v17 = vsel %vm2195_vm15, %v2192_v16, 0.0 }
0x12a6   : > { %v1699_v23 = vmul.f32 %v1698_v9, %v3673_v18 }
0x12a8   : > { %v1700_v22 = vadd.f32 %v1699_v23, %v1697_v10 }
0x12aa   : > { %vm1701_vm14 = vcmp.gt.f32.partialorder %v1700_v22, 0.0  ;;  %v1703_v57 = vmul.f32 %v1702_v11, %v1700_v22 }
0x12ac   : > { %v1704_v12 = vsel %vm1701_vm14, %v1700_v22, %v1703_v57 }
0x12ad   : > { %v2183_v13 = vsub.f32 %v1704_v12, %v3029_v51 }
0x12af   : > { %v2186_v32 = vmul.f32 %v2183_v13, %v2183_v13 }
0x12b1   : > { %2189 = vadd.xlane.f32.xlu0 %v2186_v32 }
0x12b5   : > { %2193 = vadd.xlane.f32.xlu0 %v2188_v15 }
0x12b9   : > { %2208 = vadd.xlane.f32.xlu0 %v2207_v17 }
0x133e   : > { %v2190_v18 = vpop.xlane.xlu0 %2189 }
0x133f   : > { %v2196_v35 = vsel %vm2195_vm15, %v2190_v18, 0.0 }
0x1340   : > { %2197 = vadd.xlane.f32.xlu1 %v2196_v35 }
0x1342   : > { %v2194_v24 = vpop.xlane.xlu0 %2193 }
0x1343   : > { %v2218_v25 = vsel %vm2195_vm15, %v2194_v24, 0.0 }
0x1344   : > { %2219 = vadd.xlane.f32.xlu1 %v2218_v25 }
0x1345   : > { %3169 = shalt.err (!%p3166_p7)
}
0x1346   : > { %s3170_s11 = scalar_lea.hbm %s3741_s24, 128  ;;  %s3174_s22 = scalar_lea.hbm %s3789_s5, 512 }
0x1347   : > { %p3171_p4 = scmp.ne.s32.totalorder %s3741_s24, %s3170_s11  ;;  %p3175_p3 = scmp.lt.u32.totalorder %s3741_s24, %s3789_s5 }
0x1348   : > { %p3176_p11 = scmp.lt.u32.totalorder %s3174_s22, %s3170_s11  ;;  %p3178_p6 = scmp.lt.u32.totalorder %s3170_s11, %s3741_s24 }
0x1349   : > { %p3172_p9 = pnand %p3171_p4, %p3812_p10 }
0x134a   : > { %p3177_p2 = por %p3176_p11, %p3175_p3 }
0x134b   : > { %p3173_p13 = pneg %p3172_p9 }
0x134c   : > { %p3179_p12 = por %p3178_p6, %p3177_p2 }
0x134e   : > { %p3180_p1 = pnand %p3179_p12, %p3173_p13 }
0x1350   : > { %3183 = shalt.err (!%p3180_p1)
}
0x1351   : > { %2805 = dma.vmem_to_hbm [thread:$0]  (%p3812_p10), %s2259_s23, 128, %s3741_s24, %s2242_s26   ;;  %v2209_v37 = vpop.xlane.xlu0 %2208  ;;  %v2230_v47 = vand.u32 127, %v496_v20 }
0x1352   : > { %v2210_v46 = vrot.slane %v2209_v37, 4  ;;  %p317_p10 = scmp.lt.s32.totalorder %s3319_s0, 3 }
0x1353   : > { %vm2233_vm0 = vcmp.eq.s32.totalorder %v2230_v47, 2  ;;  %vm2232_vm1 = vcmp.eq.s32.totalorder %v2230_v47, 1  ;;  %vm2231_vm2 = vcmp.eq.s32.totalorder %v2230_v47, 0 }
0x1354   : > { %v2211_v26 = vadd.f32 %v2210_v46, %v2209_v37  ;;  %s3819_s0 = smov (!%p317_p10, %s3319_s0), 3 }
0x1355   : > { %s319_s26 = scalar_lea.vmem %s3790_s6, %s3819_s0 }
0x1356   : > { %v2212_v27 = vrot.slane %v2211_v26, 2 }
0x1358   : > { %v2213_v31 = vadd.f32 %v2212_v27, %v2211_v26 }
0x135a   : > { %v2214_v40 = vrot.slane %v2213_v31, 1 }
0x135c   : > { %v2215_v44 = vadd.f32 %v2214_v40, %v2213_v31 }
0x13cd   : > { %v2198_v28 = vpop.xlane.xlu1 %2197 }
0x13ce   : > { %v2199_v29 = vrot.slane %v2198_v28, 4 }
0x13d0   : > { %v2200_v30 = vadd.f32 %v2199_v29, %v2198_v28 }
0x13d1   : > { %v2220_v33 = vpop.xlane.xlu1 %2219 }
0x13d2   : > { %v2201_v34 = vrot.slane %v2200_v30, 2  ;;  %v2221_v36 = vrot.slane %v2220_v33, 4 }
0x13d4   : > { %v2222_v0 = vadd.f32 %v2221_v36, %v2220_v33  ;;  %v2202_v38 = vadd.f32 %v2201_v34, %v2200_v30 }
0x13d6   : > { %v2223_v41 = vrot.slane %v2222_v0, 2  ;;  %v2203_v42 = vrot.slane %v2202_v38, 1 }
0x13d8   : > { %v2224_v43 = vadd.f32 %v2223_v41, %v2222_v0  ;;  %v2204_v19 = vadd.f32 %v2203_v42, %v2202_v38 }
0x13da   : > { %2787 = vpush %v2204_v19  ;;  %v2225_v45 = vrot.slane %v2224_v43, 1 }
0x13db   : > { %2789 = vpush %v2215_v44 }
0x13dc   : > { %v2226_v56 = vadd.f32 %v2225_v45, %v2224_v43 }
0x13de   : > { %2791 = vpush %v2226_v56 }
0x140b   : > { %s2788_s18 = spop %2787 }
0x140c   : > { %s2790_s27 = spop %2789  ;;  %s2206_s4 = smul.f32 0.0009765625, %s2788_s18 }
0x140d   : > { %s2217_s19 = smul.f32 0.0009765625, %s2790_s27 }
0x140e   : > { %v2238_v53 = vstv %s2206_s4 }
0x140f   : > { %s2792_s23 = spop %2791  ;;  %v2236_v49 = vstv %s2217_s19 }
0x1410   : > { %s2228_s16 = smul.f32 0.0009765625, %s2792_s23 }
0x1412   : > { %v2234_v48 = vstv %s2228_s16 }
0x1413   : > { %v2235_v52 = vsel %vm2233_vm0, %v2234_v48, 0.0 }
0x1414   : > { %v2237_v54 = vsel %vm2232_vm1, %v2236_v49, %v2235_v52 }
0x1415   : > { %v2239_v55 = vsel %vm2231_vm2, %v2238_v53, %v2237_v54 }
0x1416   : > { %2240 = vst [vmem:[%s319_s26] sm:$0x1] %v2239_v55 }
0x1417 PF: > { %p2830_p8 = scmp.ge.s32.totalorder %s3236_s10, 2  ;;  %s2273_s14 = sand.u32 1, %s3224_s7  }
0x1418   : > { %p3813_p0 = scmp.ne.s32.totalorder %s3798_s13, 0  ;;  %s2274_s25 = scalar_lea.sflag [#allocation6], %s2273_s14 }
0x141a   : > { %p2822_p5 = pnand %p2830_p8, %p3813_p0 }
0x141c   : > { %3219 = dma.done.wait (!%p2822_p5), %s2274_s25, 128  }
0x141d   : > { %3221 = vsyncadd (!%p2822_p5), %s2274_s25, 4294967168  ;;  %p28_p7 = scmp.ge.s32.totalorder %s3400_s29, 6   ;;  %s3814_s7 = smov %s3228_s8 }
0x141e   : > { %s3815_s8 = smov %s3232_s9  ;;  %s3816_s9 = smov %s3409_s15 }
0x141f   : > { %s3817_s10 = smov %s3400_s29  ;;  %30 = sbr.rel (!%p28_p7) target bundleno = 21 (0x15), region = 116 }
0x1426   :  { %2285 = vsyncpa [#allocation5], 1 }
0x1427   :  { %2287 = vsyncpa [#allocation5 + $0x1], 1 }
0x1428   :  { %2288 = vsyncpa [#allocation8], 1 }
0x1429   :  { %2290 = vsyncpa [#allocation8 + $0x1], 1 }
0x142a   :  { %2291 = vsyncpa [#allocation11], 1 }
0x142b   :  { %2292 = vsyncpa [#allocation6], 1 }
0x142c   :  { %2294 = vsyncpa [#allocation6 + $0x1], 1 }

</bundles_post_ra>
